<compile_context>
chip_gen: v5e
topology: v5e:2x2
jax: 0.10.0
libtpu: 0.0.40
codegen_flags: <defaults>
</compile_context>

<pallas_src>
import functools

import jax
import jax.numpy as jnp
import numpy as np
from jax.experimental import pallas as pl
from jax.experimental.pallas import tpu as pltpu

# TODO(synk): PyTorch nn.PReLU slope is a learned parameter; plumb it in as a kernel input
#             (scalar or per-channel) for trained checkpoints.  0.25 is the default init.
PRELU_A = 0.25
EPS = 1e-8                    # asteroid GlobLN epsilon
_STREAM_BUFFERS = 3           # pipelining depth for the streamed x / pre tensors (tiled path)


def _round_up(x, m):
    return ((x + m - 1) // m) * m


def _prelu(x, a=PRELU_A):
    return jnp.where(x >= 0, x, a * x)


def _vmem_capacity_bytes():
    try:
        return int(pltpu.get_tpu_info().vmem_capacity_bytes)
    except Exception:
        return 128 * 1024 * 1024


def _vmem_policy():
    """Generation-aware VMEM budgets: raise on 128 MiB v5e/v6e, tighten on 64 MiB/TC v7x."""
    cap = _vmem_capacity_bytes()
    if cap >= 100 * 1024 * 1024:          # v5e / v6e (128 MiB per core)
        return dict(fused_budget=72 << 20, vmem_limit=100 << 20, t_cap=2048, small_vmem=False)
    # v7x (64 MiB per TensorCore): keep compiler headroom, smaller tiles, prefer (B, nT) grid.
    return dict(fused_budget=22 << 20, vmem_limit=40 << 20, t_cap=1024, small_vmem=True)


def _bspec(shape, imap, buffers=None):
    """BlockSpec with optional deeper pipelining (graceful fallback if unsupported)."""
    if buffers is not None:
        try:
            return pl.BlockSpec(shape, imap, pipeline_mode=pl.Buffered(buffers))
        except (TypeError, AttributeError):
            pass
    return pl.BlockSpec(shape, imap)


def _pick_t_tile(T, cap):
    """Largest multiple-of-128 tile dividing round_up(T, 128), capped per generation."""
    tp = _round_up(T, 128)
    best = 128
    d = 256
    while d <= min(cap, tp):
        if tp % d == 0:
            best = d
        d += 128
    return best, tp


def _fused_vmem_bytes(M, F, T, H, cd_bytes):
    io = M * F * T * 4                                   # x block / output block (f32)
    hs = M * H * T * cd_bytes                            # persistent per-mic hidden activations
    trans = (2 * H * T + 2 * F * T) * 4 + (H * T + F * T) * cd_bytes   # mean/mv/m_term/om + casts
    weights = (H * F + H * H + 2 * F * H) * cd_bytes + (2 * H + 3 * F) * 4
    return 2 * (io + io) + hs + trans + 2 * weights      # in/out double-buffered


# --------------------------------------------------------------------------------------
# Shared transform front-end: input_tf + masked mic-mean + avg_tf + mic-independent
# half of concat_tf.  Hidden activations are kept in the compute dtype; the masked mean
# is accumulated in f32 on the fly with per-mic SCALAR weights (mask and 1/valid folded).
# --------------------------------------------------------------------------------------
def _tac_hidden_mean(x, valid, w1t, b1, w2t, b2, w3mt, b3):
    """x: (M, F, Tt) f32 -> (hs list of (H, Tt) compute-dtype, m_term (F, Tt) f32)."""
    M = x.shape[0]
    cd = w1t.dtype
    # TODO(synk): the PyTorch `valid_mics.max() == 0` fallback (mean over the chunk axis)
    #             is not reproduced; valid_mics >= 1 is assumed.
    inv_valid = 1.0 / jnp.maximum(valid, 1).astype(jnp.float32)

    hs = []
    mean_acc = None
    for m in range(M):
        hm = jnp.dot(w1t, x[m].astype(cd), preferred_element_type=jnp.float32)    # (H, Tt)
        hm = _prelu(hm + b1)                                                      # f32
        w_m = jnp.where(m < valid, inv_valid, 0.0)       # scalar: mask * 1/valid
        term = hm * w_m
        mean_acc = term if mean_acc is None else mean_acc + term                  # f32 accum
        hs.append(hm.astype(cd))                         # store hidden act in compute dtype

    mv = jnp.dot(w2t, mean_acc.astype(cd), preferred_element_type=jnp.float32)
    mv = _prelu(mv + b2)                                                          # (H, Tt) f32
    m_term = jnp.dot(w3mt, mv.astype(cd), preferred_element_type=jnp.float32) + b3  # (F, Tt)
    return hs, m_term


# --------------------------------------------------------------------------------------
# Kernel A: fully fused (whole T per batch): transform + streamed per-mic gLN + residual
# --------------------------------------------------------------------------------------
def tac_fused_kernel(valid_ref,                       # SMEM (B,) int32 (scalar prefetch)
                     x_ref,                           # (1, M, F, T) f32
                     w1t_ref, b1_ref,                 # (H, F), (H, 1)
                     w2t_ref, b2_ref,                 # (H, H), (H, 1)
                     w3ht_ref, w3mt_ref, b3_ref,      # (F, H), (F, H), (F, 1)
                     gamma_ref, beta_ref,             # (F, 1), (F, 1)
                     o_ref):                          # (1, M, F, T)
    b = pl.program_id(0)
    valid = valid_ref[b]
    x = x_ref[0]                                      # (M, F, T) f32
    M, F, T = x.shape

    hs, m_term = _tac_hidden_mean(x, valid, w1t_ref[...], b1_ref[...],
                                  w2t_ref[...], b2_ref[...], w3mt_ref[...], b3_ref[...])

    w3ht = w3ht_ref[...]
    gamma = gamma_ref[...]
    beta = beta_ref[...]
    inv_n = 1.0 / float(F * T)

    # Streamed per-mic epilogue: concat_tf -> one-pass gLN stats -> residual -> store.
    # Only one (F, T) pre-norm tile is live at a time (no full pre-norm tensor in VMEM).
    for m in range(M):
        om = _prelu(jnp.dot(w3ht, hs[m], preferred_element_type=jnp.float32) + m_term)
        s = jnp.sum(om, axis=(0, 1), keepdims=True)
        ss = jnp.sum(om * om, axis=(0, 1), keepdims=True)
        mu = s * inv_n
        var = jnp.maximum(ss * inv_n - mu * mu, 0.0)      # clamped one-pass variance
        rstd = jax.lax.rsqrt(var + EPS)
        o_ref[0, m] = ((om - mu) * rstd * gamma + beta + x[m]).astype(o_ref.dtype)


# --------------------------------------------------------------------------------------
# Kernel B1: T-tiled pass 1 -> pre-norm output + per-lane partial gLN statistics
# (lanes past the original T are masked out of the statistics when T was padded)
# --------------------------------------------------------------------------------------
def tac_stats_kernel(t_orig, needs_mask,              # static (functools.partial)
                     valid_ref,                       # SMEM (B,) int32 (scalar prefetch)
                     x_ref,                           # (1, M, F, tt) f32
                     w1t_ref, b1_ref, w2t_ref, b2_ref,
                     w3ht_ref, w3mt_ref, b3_ref,
                     pre_ref,                         # (1, M, F, tt) compute dtype
                     psum_ref):                       # (1, 2, M, tt) f32
    b = pl.program_id(0)
    t = pl.program_id(1)
    valid = valid_ref[b]
    x = x_ref[0]                                      # (M, F, tt) f32
    M, F, tt = x.shape

    hs, m_term = _tac_hidden_mean(x, valid, w1t_ref[...], b1_ref[...],
                                  w2t_ref[...], b2_ref[...], w3mt_ref[...], b3_ref[...])
    w3ht = w3ht_ref[...]

    if needs_mask:
        lane = t * tt + jax.lax.broadcasted_iota(jnp.int32, (1, tt), 1)
        lane_ok = lane < t_orig

    rows_s, rows_ss = [], []
    for m in range(M):
        om = _prelu(jnp.dot(w3ht, hs[m], preferred_element_type=jnp.float32) + m_term)
        pre_ref[0, m] = om.astype(pre_ref.dtype)
        s = jnp.sum(om, axis=0, keepdims=True)            # (1, tt)
        ss = jnp.sum(om * om, axis=0, keepdims=True)      # (1, tt)
        if needs_mask:                                    # mask AFTER the F reduction (cheap)
            s = jnp.where(lane_ok, s, 0.0)
            ss = jnp.where(lane_ok, ss, 0.0)
        rows_s.append(s)
        rows_ss.append(ss)
    psum_ref[0, 0] = jnp.concatenate(rows_s, axis=0)      # (M, tt)
    psum_ref[0, 1] = jnp.concatenate(rows_ss, axis=0)     # (M, tt)


# --------------------------------------------------------------------------------------
# Kernel B2: T-tiled pass 2 -> apply pre-folded gLN (scale/shift) + residual
# --------------------------------------------------------------------------------------
def tac_norm_kernel(x_ref,                            # (1, M, F, tt) f32
                    pre_ref,                          # (1, M, F, tt) compute dtype
                    scale_ref, shift_ref,             # (1, M, F, 1) f32 each (gLN pre-folded)
                    o_ref):                           # (1, M, F, tt)
    x = x_ref[0]                                      # (M, F, tt)
    pre = pre_ref[0].astype(jnp.float32)
    o_ref[0] = (pre * scale_ref[0] + shift_ref[0] + x).astype(o_ref.dtype)


# --------------------------------------------------------------------------------------
# Wrapper
# --------------------------------------------------------------------------------------
def tac_forward(x, params, valid_mics=None, *, compute_dtype=jnp.bfloat16,
                force_two_pass=False, t_tile=None):
    """x: (B, nmics, F, chunk_size, n_chunks) float32 -> same shape."""
    B, M, F, C, N = x.shape
    T = C * N
    H = params["w1t"].shape[0]
    policy = _vmem_policy()

    if valid_mics is None:
        valid_mics = jnp.full((B,), M, dtype=jnp.int32)
    valid_mics = valid_mics.astype(jnp.int32)

    # Free reshape (merges the two contiguous minor dims): no HBM transpose / relayout.
    xk = x.reshape(B, M, F, T)

    cd = compute_dtype
    cd_bytes = jnp.dtype(cd).itemsize
    w1t = params["w1t"].astype(cd)
    w2t = params["w2t"].astype(cd)
    w3ht = params["w3ht"].astype(cd)
    w3mt = params["w3mt"].astype(cd)
    b1 = params["b1"].astype(jnp.float32)
    b2 = params["b2"].astype(jnp.float32)
    b3 = params["b3"].astype(jnp.float32)
    gamma = params["gamma"].astype(jnp.float32)
    beta = params["beta"].astype(jnp.float32)

    use_fused = (not force_two_pass) and \
        _fused_vmem_bytes(M, F, T, H, cd_bytes) <= policy["fused_budget"]
    if use_fused and policy["small_vmem"] and B < 2:
        # v7x: grid=(B,) cannot shard across the 2 TensorCores when B == 1; the two-pass
        # (B, nT) grid can, so prefer it when it yields >= 2 T-tiles.
        tt_try, tp_try = _pick_t_tile(T, policy["t_cap"])
        if tp_try // tt_try >= 2:
            use_fused = False

    if use_fused:
        out = pl.pallas_call(
            tac_fused_kernel,
            out_shape=jax.ShapeDtypeStruct((B, M, F, T), x.dtype),
            grid_spec=pltpu.PrefetchScalarGridSpec(
                num_scalar_prefetch=1,
                grid=(B,),
                in_specs=[
                    pl.BlockSpec((1, M, F, T), lambda b, vm: (b, 0, 0, 0)),
                    pl.BlockSpec((H, F), lambda b, vm: (0, 0)),
                    pl.BlockSpec((H, 1), lambda b, vm: (0, 0)),
                    pl.BlockSpec((H, H), lambda b, vm: (0, 0)),
                    pl.BlockSpec((H, 1), lambda b, vm: (0, 0)),
                    pl.BlockSpec((F, H), lambda b, vm: (0, 0)),
                    pl.BlockSpec((F, H), lambda b, vm: (0, 0)),
                    pl.BlockSpec((F, 1), lambda b, vm: (0, 0)),
                    pl.BlockSpec((F, 1), lambda b, vm: (0, 0)),
                    pl.BlockSpec((F, 1), lambda b, vm: (0, 0)),
                ],
                out_specs=pl.BlockSpec((1, M, F, T), lambda b, vm: (b, 0, 0, 0)),
            ),
            compiler_params=pltpu.CompilerParams(
                dimension_semantics=("parallel",),
                vmem_limit_bytes=policy["vmem_limit"]),
        )(valid_mics, xk, w1t, b1, w2t, b2, w3ht, w3mt, b3, gamma, beta)
        return out.reshape(B, M, F, C, N)

    # ---------------- tiled two-pass path ----------------
    if t_tile is not None:
        tt = t_tile
        Tp = _round_up(T, tt)
    else:
        tt, Tp = _pick_t_tile(T, policy["t_cap"])
    nT = Tp // tt
    needs_mask = (Tp != T)
    xk_p = xk if not needs_mask else jnp.pad(xk, ((0, 0), (0, 0), (0, 0), (0, Tp - T)))

    stats_kernel = functools.partial(tac_stats_kernel, T, needs_mask)

    pre, psum = pl.pallas_call(
        stats_kernel,
        out_shape=(jax.ShapeDtypeStruct((B, M, F, Tp), cd),
                   jax.ShapeDtypeStruct((B, 2, M, Tp), jnp.float32)),
        grid_spec=pltpu.PrefetchScalarGridSpec(
            num_scalar_prefetch=1,
            grid=(B, nT),
            in_specs=[
                _bspec((1, M, F, tt), lambda b, t, vm: (b, 0, 0, t), buffers=_STREAM_BUFFERS),
                pl.BlockSpec((H, F), lambda b, t, vm: (0, 0)),
                pl.BlockSpec((H, 1), lambda b, t, vm: (0, 0)),
                pl.BlockSpec((H, H), lambda b, t, vm: (0, 0)),
                pl.BlockSpec((H, 1), lambda b, t, vm: (0, 0)),
                pl.BlockSpec((F, H), lambda b, t, vm: (0, 0)),
                pl.BlockSpec((F, H), lambda b, t, vm: (0, 0)),
                pl.BlockSpec((F, 1), lambda b, t, vm: (0, 0)),
            ],
            out_specs=(
                pl.BlockSpec((1, M, F, tt), lambda b, t, vm: (b, 0, 0, t)),
                pl.BlockSpec((1, 2, M, tt), lambda b, t, vm: (b, 0, 0, t)),
            ),
        ),
        compiler_params=pltpu.CompilerParams(
            dimension_semantics=("parallel", "parallel"),
            vmem_limit_bytes=policy["vmem_limit"]),
    )(valid_mics, xk_p, w1t, b1, w2t, b2, w3ht, w3mt, b3)

    # Tiny gLN-statistics finalize (B*M scalars): fold gamma/beta/mu/rstd into per-(b,m,f)
    # scale/shift so pass 2 is a single fused multiply-add (+ residual) with no tiny DMAs.
    n_elem = float(F * T)
    s = jnp.sum(psum[:, 0], axis=-1)                      # (B, M)
    ss = jnp.sum(psum[:, 1], axis=-1)                     # (B, M)
    mu = s / n_elem
    var = jnp.maximum(ss / n_elem - mu * mu, 0.0)
    rstd = jax.lax.rsqrt(var + EPS)
    g_row = gamma[:, 0]                                   # (F,)
    b_row = beta[:, 0]                                    # (F,)
    scale = rstd[:, :, None] * g_row[None, None, :]                     # (B, M, F)
    shift = b_row[None, None, :] - mu[:, :, None] * scale               # (B, M, F)
    scale4 = scale.reshape(B, M, F, 1).astype(jnp.float32)
    shift4 = shift.reshape(B, M, F, 1).astype(jnp.float32)

    out = pl.pallas_call(
        tac_norm_kernel,
        out_shape=jax.ShapeDtypeStruct((B, M, F, Tp), x.dtype),
        grid_spec=pltpu.PrefetchScalarGridSpec(
            num_scalar_prefetch=0,
            grid=(B, nT),
            in_specs=[
                _bspec((1, M, F, tt), lambda b, t: (b, 0, 0, t), buffers=_STREAM_BUFFERS),
                _bspec((1, M, F, tt), lambda b, t: (b, 0, 0, t), buffers=_STREAM_BUFFERS),
                pl.BlockSpec((1, M, F, 1), lambda b, t: (b, 0, 0, 0)),
                pl.BlockSpec((1, M, F, 1), lambda b, t: (b, 0, 0, 0)),
            ],
            out_specs=pl.BlockSpec((1, M, F, tt), lambda b, t: (b, 0, 0, t)),
        ),
        compiler_params=pltpu.CompilerParams(
            dimension_semantics=("parallel", "parallel"),
            vmem_limit_bytes=policy["vmem_limit"]),
    )(xk_p, pre, scale4, shift4)

    if needs_mask:
        out = out[..., :T]
    return out.reshape(B, M, F, C, N)


# --------------------------------------------------------------------------------------
# Pure-JAX reference (mirrors the PyTorch forward) and synthetic parameters
# --------------------------------------------------------------------------------------
def tac_reference(x, params, valid_mics=None):
    B, M, F, C, N = x.shape
    if valid_mics is None:
        valid_mics = jnp.full((B,), M, dtype=jnp.int32)
    xp = jnp.transpose(x, (0, 3, 4, 1, 2))                          # (B, C, N, M, F)
    h = _prelu(xp @ params["w1t"].T + params["b1"][:, 0])           # (B, C, N, M, H)
    mask = (jnp.arange(M)[None, :] < valid_mics[:, None]).astype(x.dtype)
    denom = jnp.maximum(valid_mics, 1).astype(x.dtype)
    mean = jnp.einsum("bcnmh,bm->bcnh", h, mask) / denom[:, None, None, None]
    m = _prelu(mean @ params["w2t"].T + params["b2"][:, 0])         # (B, C, N, H)
    out = h @ params["w3ht"].T + (m @ params["w3mt"].T)[:, :, :, None, :] + params["b3"][:, 0]
    out = _prelu(out)                                               # (B, C, N, M, F)
    outp = jnp.transpose(out, (0, 3, 4, 1, 2))                      # (B, M, F, C, N)
    mu = jnp.mean(outp, axis=(2, 3, 4), keepdims=True)
    var = jnp.mean((outp - mu) ** 2, axis=(2, 3, 4), keepdims=True)
    normed = (outp - mu) / jnp.sqrt(var + EPS)
    g = params["gamma"][:, 0][None, None, :, None, None]
    bt = params["beta"][:, 0][None, None, :, None, None]
    return normed * g + bt + x


def init_params(key, input_dim, hidden_dim):
    """Deterministic synthetic parameters (torch-Linear-like uniform init, (out, in) layout)."""
    ks = jax.random.split(key, 6)

    def lin(k, fan_in, shape):
        bound = 1.0 / np.sqrt(fan_in)
        return jax.random.uniform(k, shape, jnp.float32, -bound, bound)

    F, H = input_dim, hidden_dim
    w3 = lin(ks[4], 2 * H, (F, 2 * H))            # concat_tf weight, torch layout (out, in)
    return {
        "w1t": lin(ks[0], F, (H, F)),             # input_tf weight
        "b1": lin(ks[1], F, (H, 1)),
        "w2t": lin(ks[2], H, (H, H)),             # avg_tf weight
        "b2": lin(ks[3], H, (H, 1)),
        "w3ht": w3[:, :H],                        # concat_tf split: h part
        "w3mt": w3[:, H:],                        # concat_tf split: mean part
        "b3": lin(ks[5], 2 * H, (F, 1)),
        "gamma": jnp.ones((F, 1), jnp.float32),   # gLN init
        "beta": jnp.zeros((F, 1), jnp.float32),
    }


if __name__ == "__main__":
    B, M, F, C, N = 2, 3, 16, 8, 4      # batch, mics, input_dim, chunk_size, n_chunks
    H = 32                              # hidden_dim (small synthetic size)

    key = jax.random.PRNGKey(0)
    kx, kp = jax.random.split(key)
    x = jax.random.normal(kx, (B, M, F, C, N), jnp.float32)
    params = init_params(kp, F, H)
    valid_mics = jnp.array([3, 2], dtype=jnp.int32)   # padded-mic example

    ref = tac_reference(x, params, valid_mics)

    # 1) fused path, f32 MXU operands -> tight check.
    out_f32 = jax.block_until_ready(
        tac_forward(x, params, valid_mics, compute_dtype=jnp.float32))
    np.testing.assert_allclose(np.asarray(out_f32), np.asarray(ref), rtol=2e-3, atol=2e-3)

    # 2) fused path, default bf16 MXU operands (f32 accumulation) -> looser check.
    out_bf = jax.block_until_ready(tac_forward(x, params, valid_mics))
    np.testing.assert_allclose(np.asarray(out_bf), np.asarray(ref), rtol=5e-2, atol=6e-2)

    # 3) T-tiled two-pass path (forced), f32 -> exercises padding+masked stats, tight check.
    out_tiled_f32 = jax.block_until_ready(
        tac_forward(x, params, valid_mics, compute_dtype=jnp.float32, force_two_pass=True))
    np.testing.assert_allclose(np.asarray(out_tiled_f32), np.asarray(ref), rtol=2e-3, atol=2e-3)

    # 4) T-tiled two-pass path (forced), bf16.
    out_tiled = jax.block_until_ready(
        tac_forward(x, params, valid_mics, force_two_pass=True))
    np.testing.assert_allclose(np.asarray(out_tiled), np.asarray(ref), rtol=5e-2, atol=6e-2)

    assert out_bf.shape == x.shape
    print("KERNEL_OK")
</pallas_src>

<mosaic_0001>
module attributes {stable_mosaic.version = 11 : i64} {
  func.func @tac_fused_kernel(%arg0: i32, %arg1: memref<2xi32, #tpu.memory_space<smem>>, %arg2: memref<1x3x16x32xf32, #tpu.memory_space<vmem>>, %arg3: memref<32x16xf32, #tpu.memory_space<vmem>>, %arg4: memref<32x1xf32, #tpu.memory_space<vmem>>, %arg5: memref<32x32xf32, #tpu.memory_space<vmem>>, %arg6: memref<32x1xf32, #tpu.memory_space<vmem>>, %arg7: memref<16x32xf32, #tpu.memory_space<vmem>>, %arg8: memref<16x32xf32, #tpu.memory_space<vmem>>, %arg9: memref<16x1xf32, #tpu.memory_space<vmem>>, %arg10: memref<16x1xf32, #tpu.memory_space<vmem>>, %arg11: memref<16x1xf32, #tpu.memory_space<vmem>>, %arg12: memref<1x3x16x32xf32, #tpu.memory_space<vmem>>) attributes {dimension_semantics = [#tpu.dimension_semantics<parallel>], iteration_bounds = array<i64: 2>, scalar_prefetch = 1 : i64, scratch_operands = 0 : i64, tpu.core_type = #tpu.core_type<tc>, window_params = [{transform_indices = @transform_0, window_bounds = array<i64: 1, 3, 16, 32>}, {pipeline_mode = #tpu.pipeline_mode<synchronous>, transform_indices = @transform_1, window_bounds = array<i64: 32, 16>}, {pipeline_mode = #tpu.pipeline_mode<synchronous>, transform_indices = @transform_2, window_bounds = array<i64: 32, 1>}, {pipeline_mode = #tpu.pipeline_mode<synchronous>, transform_indices = @transform_3, window_bounds = array<i64: 32, 32>}, {pipeline_mode = #tpu.pipeline_mode<synchronous>, transform_indices = @transform_4, window_bounds = array<i64: 32, 1>}, {pipeline_mode = #tpu.pipeline_mode<synchronous>, transform_indices = @transform_5, window_bounds = array<i64: 16, 32>}, {pipeline_mode = #tpu.pipeline_mode<synchronous>, transform_indices = @transform_6, window_bounds = array<i64: 16, 32>}, {pipeline_mode = #tpu.pipeline_mode<synchronous>, transform_indices = @transform_7, window_bounds = array<i64: 16, 1>}, {pipeline_mode = #tpu.pipeline_mode<synchronous>, transform_indices = @transform_8, window_bounds = array<i64: 16, 1>}, {pipeline_mode = #tpu.pipeline_mode<synchronous>, transform_indices = @transform_9, window_bounds = array<i64: 16, 1>}, {transform_indices = @transform_10, window_bounds = array<i64: 1, 3, 16, 32>}]} {
    %0 = arith.index_cast %arg0 : i32 to index
    %1 = memref.load %arg1[%0] : memref<2xi32, #tpu.memory_space<smem>>
    %c0 = arith.constant 0 : index
    %c0_0 = arith.constant 0 : index
    %c0_1 = arith.constant 0 : index
    %c0_2 = arith.constant 0 : index
    %2 = vector.load %arg2[%c0, %c0_0, %c0_1, %c0_2] : memref<1x3x16x32xf32, #tpu.memory_space<vmem>>, vector<1x3x16x32xf32>
    %3 = vector.shape_cast %2 : vector<1x3x16x32xf32> to vector<3x16x32xf32>
    %c0_3 = arith.constant 0 : index
    %c0_4 = arith.constant 0 : index
    %4 = vector.load %arg3[%c0_3, %c0_4] : memref<32x16xf32, #tpu.memory_space<vmem>>, vector<32x16xf32>
    %c0_5 = arith.constant 0 : index
    %c0_6 = arith.constant 0 : index
    %5 = vector.load %arg4[%c0_5, %c0_6] : memref<32x1xf32, #tpu.memory_space<vmem>>, vector<32x1xf32>
    %c0_7 = arith.constant 0 : index
    %c0_8 = arith.constant 0 : index
    %6 = vector.load %arg5[%c0_7, %c0_8] : memref<32x32xf32, #tpu.memory_space<vmem>>, vector<32x32xf32>
    %c0_9 = arith.constant 0 : index
    %c0_10 = arith.constant 0 : index
    %7 = vector.load %arg6[%c0_9, %c0_10] : memref<32x1xf32, #tpu.memory_space<vmem>>, vector<32x1xf32>
    %c0_11 = arith.constant 0 : index
    %c0_12 = arith.constant 0 : index
    %8 = vector.load %arg8[%c0_11, %c0_12] : memref<16x32xf32, #tpu.memory_space<vmem>>, vector<16x32xf32>
    %c0_13 = arith.constant 0 : index
    %c0_14 = arith.constant 0 : index
    %9 = vector.load %arg9[%c0_13, %c0_14] : memref<16x1xf32, #tpu.memory_space<vmem>>, vector<16x1xf32>
    %c1_i32 = arith.constant 1 : i32
    %10 = arith.maxsi %1, %c1_i32 : i32
    %11 = arith.sitofp %10 : i32 to f32
    %cst = arith.constant 1.000000e+00 : f32
    %12 = arith.divf %cst, %11 : f32
    %13 = vector.extract_strided_slice %3 {offsets = [0, 0, 0], sizes = [1, 16, 32], strides = [1, 1, 1]} : vector<3x16x32xf32> to vector<1x16x32xf32>
    %14 = vector.shape_cast %13 : vector<1x16x32xf32> to vector<16x32xf32>
    %cst_15 = arith.constant dense<0.000000e+00> : vector<32x32xf32>
    %15 = tpu.matmul %4, %14, %cst_15 {dimension_numbers = #tpu.dot_dimension_numbers<[1], [0], [0], [1], [0, 0, 1, 1], [], []>} : vector<32x16xf32>, vector<16x32xf32>, vector<32x32xf32> -> vector<32x32xf32>
    %16 = vector.broadcast %5 : vector<32x1xf32> to vector<32x32xf32>
    %17 = arith.addf %15, %16 : vector<32x32xf32>
    %cst_16 = arith.constant 0.000000e+00 : f32
    %18 = vector.broadcast %cst_16 : f32 to vector<32x32xf32>
    %19 = arith.cmpf oge, %17, %18 : vector<32x32xf32>
    %cst_17 = arith.constant 2.500000e-01 : f32
    %20 = vector.broadcast %cst_17 : f32 to vector<32x32xf32>
    %21 = arith.mulf %20, %17 : vector<32x32xf32>
    %22 = arith.select %19, %17, %21 : vector<32x32xi1>, vector<32x32xf32>
    %c0_i32 = arith.constant 0 : i32
    %23 = arith.cmpi sgt, %1, %c0_i32 : i32
    %cst_18 = arith.constant 0.000000e+00 : f32
    %24 = arith.select %23, %12, %cst_18 : f32
    %25 = vector.broadcast %24 : f32 to vector<32x32xf32>
    %26 = arith.mulf %22, %25 : vector<32x32xf32>
    %27 = vector.extract_strided_slice %3 {offsets = [1, 0, 0], sizes = [1, 16, 32], strides = [1, 1, 1]} : vector<3x16x32xf32> to vector<1x16x32xf32>
    %28 = vector.shape_cast %27 : vector<1x16x32xf32> to vector<16x32xf32>
    %cst_19 = arith.constant dense<0.000000e+00> : vector<32x32xf32>
    %29 = tpu.matmul %4, %28, %cst_19 {dimension_numbers = #tpu.dot_dimension_numbers<[1], [0], [0], [1], [0, 0, 1, 1], [], []>} : vector<32x16xf32>, vector<16x32xf32>, vector<32x32xf32> -> vector<32x32xf32>
    %30 = vector.broadcast %5 : vector<32x1xf32> to vector<32x32xf32>
    %31 = arith.addf %29, %30 : vector<32x32xf32>
    %cst_20 = arith.constant 0.000000e+00 : f32
    %32 = vector.broadcast %cst_20 : f32 to vector<32x32xf32>
    %33 = arith.cmpf oge, %31, %32 : vector<32x32xf32>
    %cst_21 = arith.constant 2.500000e-01 : f32
    %34 = vector.broadcast %cst_21 : f32 to vector<32x32xf32>
    %35 = arith.mulf %34, %31 : vector<32x32xf32>
    %36 = arith.select %33, %31, %35 : vector<32x32xi1>, vector<32x32xf32>
    %c1_i32_22 = arith.constant 1 : i32
    %37 = arith.cmpi sgt, %1, %c1_i32_22 : i32
    %cst_23 = arith.constant 0.000000e+00 : f32
    %38 = arith.select %37, %12, %cst_23 : f32
    %39 = vector.broadcast %38 : f32 to vector<32x32xf32>
    %40 = arith.mulf %36, %39 : vector<32x32xf32>
    %41 = arith.addf %26, %40 : vector<32x32xf32>
    %42 = vector.extract_strided_slice %3 {offsets = [2, 0, 0], sizes = [1, 16, 32], strides = [1, 1, 1]} : vector<3x16x32xf32> to vector<1x16x32xf32>
    %43 = vector.shape_cast %42 : vector<1x16x32xf32> to vector<16x32xf32>
    %cst_24 = arith.constant dense<0.000000e+00> : vector<32x32xf32>
    %44 = tpu.matmul %4, %43, %cst_24 {dimension_numbers = #tpu.dot_dimension_numbers<[1], [0], [0], [1], [0, 0, 1, 1], [], []>} : vector<32x16xf32>, vector<16x32xf32>, vector<32x32xf32> -> vector<32x32xf32>
    %45 = vector.broadcast %5 : vector<32x1xf32> to vector<32x32xf32>
    %46 = arith.addf %44, %45 : vector<32x32xf32>
    %cst_25 = arith.constant 0.000000e+00 : f32
    %47 = vector.broadcast %cst_25 : f32 to vector<32x32xf32>
    %48 = arith.cmpf oge, %46, %47 : vector<32x32xf32>
    %cst_26 = arith.constant 2.500000e-01 : f32
    %49 = vector.broadcast %cst_26 : f32 to vector<32x32xf32>
    %50 = arith.mulf %49, %46 : vector<32x32xf32>
    %51 = arith.select %48, %46, %50 : vector<32x32xi1>, vector<32x32xf32>
    %c2_i32 = arith.constant 2 : i32
    %52 = arith.cmpi sgt, %1, %c2_i32 : i32
    %cst_27 = arith.constant 0.000000e+00 : f32
    %53 = arith.select %52, %12, %cst_27 : f32
    %54 = vector.broadcast %53 : f32 to vector<32x32xf32>
    %55 = arith.mulf %51, %54 : vector<32x32xf32>
    %56 = arith.addf %41, %55 : vector<32x32xf32>
    %cst_28 = arith.constant dense<0.000000e+00> : vector<32x32xf32>
    %57 = tpu.matmul %6, %56, %cst_28 {dimension_numbers = #tpu.dot_dimension_numbers<[1], [0], [0], [1], [0, 0, 1, 1], [], []>} : vector<32x32xf32>, vector<32x32xf32>, vector<32x32xf32> -> vector<32x32xf32>
    %58 = vector.broadcast %7 : vector<32x1xf32> to vector<32x32xf32>
    %59 = arith.addf %57, %58 : vector<32x32xf32>
    %cst_29 = arith.constant 0.000000e+00 : f32
    %60 = vector.broadcast %cst_29 : f32 to vector<32x32xf32>
    %61 = arith.cmpf oge, %59, %60 : vector<32x32xf32>
    %cst_30 = arith.constant 2.500000e-01 : f32
    %62 = vector.broadcast %cst_30 : f32 to vector<32x32xf32>
    %63 = arith.mulf %62, %59 : vector<32x32xf32>
    %64 = arith.select %61, %59, %63 : vector<32x32xi1>, vector<32x32xf32>
    %cst_31 = arith.constant dense<0.000000e+00> : vector<16x32xf32>
    %65 = tpu.matmul %8, %64, %cst_31 {dimension_numbers = #tpu.dot_dimension_numbers<[1], [0], [0], [1], [0, 0, 1, 1], [], []>} : vector<16x32xf32>, vector<32x32xf32>, vector<16x32xf32> -> vector<16x32xf32>
    %66 = vector.broadcast %9 : vector<16x1xf32> to vector<16x32xf32>
    %67 = arith.addf %65, %66 : vector<16x32xf32>
    %c0_32 = arith.constant 0 : index
    %c0_33 = arith.constant 0 : index
    %68 = vector.load %arg7[%c0_32, %c0_33] : memref<16x32xf32, #tpu.memory_space<vmem>>, vector<16x32xf32>
    %c0_34 = arith.constant 0 : index
    %c0_35 = arith.constant 0 : index
    %69 = vector.load %arg10[%c0_34, %c0_35] : memref<16x1xf32, #tpu.memory_space<vmem>>, vector<16x1xf32>
    %c0_36 = arith.constant 0 : index
    %c0_37 = arith.constant 0 : index
    %70 = vector.load %arg11[%c0_36, %c0_37] : memref<16x1xf32, #tpu.memory_space<vmem>>, vector<16x1xf32>
    %cst_38 = arith.constant dense<0.000000e+00> : vector<16x32xf32>
    %71 = tpu.matmul %68, %22, %cst_38 {dimension_numbers = #tpu.dot_dimension_numbers<[1], [0], [0], [1], [0, 0, 1, 1], [], []>} : vector<16x32xf32>, vector<32x32xf32>, vector<16x32xf32> -> vector<16x32xf32>
    %72 = arith.addf %71, %67 : vector<16x32xf32>
    %cst_39 = arith.constant 0.000000e+00 : f32
    %73 = vector.broadcast %cst_39 : f32 to vector<16x32xf32>
    %74 = arith.cmpf oge, %72, %73 : vector<16x32xf32>
    %cst_40 = arith.constant 2.500000e-01 : f32
    %75 = vector.broadcast %cst_40 : f32 to vector<16x32xf32>
    %76 = arith.mulf %75, %72 : vector<16x32xf32>
    %77 = arith.select %74, %72, %76 : vector<16x32xi1>, vector<16x32xf32>
    %78 = vector.shape_cast %77 : vector<16x32xf32> to vector<1x16x32xf32>
    %cst_41 = arith.constant dense<0.000000e+00> : vector<1xf32>
    %79 = vector.multi_reduction <add>, %78, %cst_41 [1, 2] : vector<1x16x32xf32> to vector<1xf32>
    %80 = vector.shape_cast %79 : vector<1xf32> to vector<1x1x1xf32>
    %81 = vector.extract %80[0, 0, 0] : f32 from vector<1x1x1xf32>
    %82 = vector.broadcast %81 : f32 to vector<1x1xf32>
    %83 = arith.mulf %77, %77 : vector<16x32xf32>
    %84 = vector.shape_cast %83 : vector<16x32xf32> to vector<1x16x32xf32>
    %cst_42 = arith.constant dense<0.000000e+00> : vector<1xf32>
    %85 = vector.multi_reduction <add>, %84, %cst_42 [1, 2] : vector<1x16x32xf32> to vector<1xf32>
    %86 = vector.shape_cast %85 : vector<1xf32> to vector<1x1x1xf32>
    %87 = vector.extract %86[0, 0, 0] : f32 from vector<1x1x1xf32>
    %88 = vector.broadcast %87 : f32 to vector<1x1xf32>
    %cst_43 = arith.constant 0.001953125 : f32
    %89 = vector.broadcast %cst_43 : f32 to vector<1x1xf32>
    %90 = arith.mulf %82, %89 : vector<1x1xf32>
    %cst_44 = arith.constant 0.001953125 : f32
    %91 = vector.broadcast %cst_44 : f32 to vector<1x1xf32>
    %92 = arith.mulf %88, %91 : vector<1x1xf32>
    %93 = arith.mulf %90, %90 : vector<1x1xf32>
    %94 = arith.subf %92, %93 : vector<1x1xf32>
    %cst_45 = arith.constant 0.000000e+00 : f32
    %95 = vector.broadcast %cst_45 : f32 to vector<1x1xf32>
    %96 = arith.maximumf %94, %95 : vector<1x1xf32>
    %cst_46 = arith.constant 9.99999993E-9 : f32
    %97 = vector.broadcast %cst_46 : f32 to vector<1x1xf32>
    %98 = arith.addf %96, %97 : vector<1x1xf32>
    %99 = math.rsqrt %98 : vector<1x1xf32>
    %100 = vector.broadcast %90 : vector<1x1xf32> to vector<16x32xf32>
    %101 = arith.subf %77, %100 : vector<16x32xf32>
    %102 = vector.broadcast %99 : vector<1x1xf32> to vector<16x32xf32>
    %103 = arith.mulf %101, %102 : vector<16x32xf32>
    %104 = vector.broadcast %69 : vector<16x1xf32> to vector<16x32xf32>
    %105 = arith.mulf %103, %104 : vector<16x32xf32>
    %106 = vector.broadcast %70 : vector<16x1xf32> to vector<16x32xf32>
    %107 = arith.addf %105, %106 : vector<16x32xf32>
    %108 = vector.extract_strided_slice %3 {offsets = [0, 0, 0], sizes = [1, 16, 32], strides = [1, 1, 1]} : vector<3x16x32xf32> to vector<1x16x32xf32>
    %109 = vector.shape_cast %108 : vector<1x16x32xf32> to vector<16x32xf32>
    %110 = arith.addf %107, %109 : vector<16x32xf32>
    %c0_47 = arith.constant 0 : index
    %c0_48 = arith.constant 0 : index
    %c0_49 = arith.constant 0 : index
    %c0_50 = arith.constant 0 : index
    %111 = vector.load %arg12[%c0_47, %c0_48, %c0_49, %c0_50] : memref<1x3x16x32xf32, #tpu.memory_space<vmem>>, vector<1x1x16x32xf32>
    %112 = vector.shape_cast %111 : vector<1x1x16x32xf32> to vector<16x32xf32>
    %113 = vector.shape_cast %110 : vector<16x32xf32> to vector<1x1x16x32xf32>
    tpu.vector_store %arg12[%c0_47, %c0_48, %c0_49, %c0_50], %113 {strides = array<i32>} : memref<1x3x16x32xf32, #tpu.memory_space<vmem>>, vector<1x1x16x32xf32>,
    %cst_51 = arith.constant dense<0.000000e+00> : vector<16x32xf32>
    %114 = tpu.matmul %68, %36, %cst_51 {dimension_numbers = #tpu.dot_dimension_numbers<[1], [0], [0], [1], [0, 0, 1, 1], [], []>} : vector<16x32xf32>, vector<32x32xf32>, vector<16x32xf32> -> vector<16x32xf32>
    %115 = arith.addf %114, %67 : vector<16x32xf32>
    %cst_52 = arith.constant 0.000000e+00 : f32
    %116 = vector.broadcast %cst_52 : f32 to vector<16x32xf32>
    %117 = arith.cmpf oge, %115, %116 : vector<16x32xf32>
    %cst_53 = arith.constant 2.500000e-01 : f32
    %118 = vector.broadcast %cst_53 : f32 to vector<16x32xf32>
    %119 = arith.mulf %118, %115 : vector<16x32xf32>
    %120 = arith.select %117, %115, %119 : vector<16x32xi1>, vector<16x32xf32>
    %121 = vector.shape_cast %120 : vector<16x32xf32> to vector<1x16x32xf32>
    %cst_54 = arith.constant dense<0.000000e+00> : vector<1xf32>
    %122 = vector.multi_reduction <add>, %121, %cst_54 [1, 2] : vector<1x16x32xf32> to vector<1xf32>
    %123 = vector.shape_cast %122 : vector<1xf32> to vector<1x1x1xf32>
    %124 = vector.extract %123[0, 0, 0] : f32 from vector<1x1x1xf32>
    %125 = vector.broadcast %124 : f32 to vector<1x1xf32>
    %126 = arith.mulf %120, %120 : vector<16x32xf32>
    %127 = vector.shape_cast %126 : vector<16x32xf32> to vector<1x16x32xf32>
    %cst_55 = arith.constant dense<0.000000e+00> : vector<1xf32>
    %128 = vector.multi_reduction <add>, %127, %cst_55 [1, 2] : vector<1x16x32xf32> to vector<1xf32>
    %129 = vector.shape_cast %128 : vector<1xf32> to vector<1x1x1xf32>
    %130 = vector.extract %129[0, 0, 0] : f32 from vector<1x1x1xf32>
    %131 = vector.broadcast %130 : f32 to vector<1x1xf32>
    %cst_56 = arith.constant 0.001953125 : f32
    %132 = vector.broadcast %cst_56 : f32 to vector<1x1xf32>
    %133 = arith.mulf %125, %132 : vector<1x1xf32>
    %cst_57 = arith.constant 0.001953125 : f32
    %134 = vector.broadcast %cst_57 : f32 to vector<1x1xf32>
    %135 = arith.mulf %131, %134 : vector<1x1xf32>
    %136 = arith.mulf %133, %133 : vector<1x1xf32>
    %137 = arith.subf %135, %136 : vector<1x1xf32>
    %cst_58 = arith.constant 0.000000e+00 : f32
    %138 = vector.broadcast %cst_58 : f32 to vector<1x1xf32>
    %139 = arith.maximumf %137, %138 : vector<1x1xf32>
    %cst_59 = arith.constant 9.99999993E-9 : f32
    %140 = vector.broadcast %cst_59 : f32 to vector<1x1xf32>
    %141 = arith.addf %139, %140 : vector<1x1xf32>
    %142 = math.rsqrt %141 : vector<1x1xf32>
    %143 = vector.broadcast %133 : vector<1x1xf32> to vector<16x32xf32>
    %144 = arith.subf %120, %143 : vector<16x32xf32>
    %145 = vector.broadcast %142 : vector<1x1xf32> to vector<16x32xf32>
    %146 = arith.mulf %144, %145 : vector<16x32xf32>
    %147 = vector.broadcast %69 : vector<16x1xf32> to vector<16x32xf32>
    %148 = arith.mulf %146, %147 : vector<16x32xf32>
    %149 = vector.broadcast %70 : vector<16x1xf32> to vector<16x32xf32>
    %150 = arith.addf %148, %149 : vector<16x32xf32>
    %151 = vector.extract_strided_slice %3 {offsets = [1, 0, 0], sizes = [1, 16, 32], strides = [1, 1, 1]} : vector<3x16x32xf32> to vector<1x16x32xf32>
    %152 = vector.shape_cast %151 : vector<1x16x32xf32> to vector<16x32xf32>
    %153 = arith.addf %150, %152 : vector<16x32xf32>
    %c0_60 = arith.constant 0 : index
    %c1 = arith.constant 1 : index
    %c0_61 = arith.constant 0 : index
    %c0_62 = arith.constant 0 : index
    %154 = vector.load %arg12[%c0_60, %c1, %c0_61, %c0_62] : memref<1x3x16x32xf32, #tpu.memory_space<vmem>>, vector<1x1x16x32xf32>
    %155 = vector.shape_cast %154 : vector<1x1x16x32xf32> to vector<16x32xf32>
    %156 = vector.shape_cast %153 : vector<16x32xf32> to vector<1x1x16x32xf32>
    tpu.vector_store %arg12[%c0_60, %c1, %c0_61, %c0_62], %156 {strides = array<i32>} : memref<1x3x16x32xf32, #tpu.memory_space<vmem>>, vector<1x1x16x32xf32>,
    %cst_63 = arith.constant dense<0.000000e+00> : vector<16x32xf32>
    %157 = tpu.matmul %68, %51, %cst_63 {dimension_numbers = #tpu.dot_dimension_numbers<[1], [0], [0], [1], [0, 0, 1, 1], [], []>} : vector<16x32xf32>, vector<32x32xf32>, vector<16x32xf32> -> vector<16x32xf32>
    %158 = arith.addf %157, %67 : vector<16x32xf32>
    %cst_64 = arith.constant 0.000000e+00 : f32
    %159 = vector.broadcast %cst_64 : f32 to vector<16x32xf32>
    %160 = arith.cmpf oge, %158, %159 : vector<16x32xf32>
    %cst_65 = arith.constant 2.500000e-01 : f32
    %161 = vector.broadcast %cst_65 : f32 to vector<16x32xf32>
    %162 = arith.mulf %161, %158 : vector<16x32xf32>
    %163 = arith.select %160, %158, %162 : vector<16x32xi1>, vector<16x32xf32>
    %164 = vector.shape_cast %163 : vector<16x32xf32> to vector<1x16x32xf32>
    %cst_66 = arith.constant dense<0.000000e+00> : vector<1xf32>
    %165 = vector.multi_reduction <add>, %164, %cst_66 [1, 2] : vector<1x16x32xf32> to vector<1xf32>
    %166 = vector.shape_cast %165 : vector<1xf32> to vector<1x1x1xf32>
    %167 = vector.extract %166[0, 0, 0] : f32 from vector<1x1x1xf32>
    %168 = vector.broadcast %167 : f32 to vector<1x1xf32>
    %169 = arith.mulf %163, %163 : vector<16x32xf32>
    %170 = vector.shape_cast %169 : vector<16x32xf32> to vector<1x16x32xf32>
    %cst_67 = arith.constant dense<0.000000e+00> : vector<1xf32>
    %171 = vector.multi_reduction <add>, %170, %cst_67 [1, 2] : vector<1x16x32xf32> to vector<1xf32>
    %172 = vector.shape_cast %171 : vector<1xf32> to vector<1x1x1xf32>
    %173 = vector.extract %172[0, 0, 0] : f32 from vector<1x1x1xf32>
    %174 = vector.broadcast %173 : f32 to vector<1x1xf32>
    %cst_68 = arith.constant 0.001953125 : f32
    %175 = vector.broadcast %cst_68 : f32 to vector<1x1xf32>
    %176 = arith.mulf %168, %175 : vector<1x1xf32>
    %cst_69 = arith.constant 0.001953125 : f32
    %177 = vector.broadcast %cst_69 : f32 to vector<1x1xf32>
    %178 = arith.mulf %174, %177 : vector<1x1xf32>
    %179 = arith.mulf %176, %176 : vector<1x1xf32>
    %180 = arith.subf %178, %179 : vector<1x1xf32>
    %cst_70 = arith.constant 0.000000e+00 : f32
    %181 = vector.broadcast %cst_70 : f32 to vector<1x1xf32>
    %182 = arith.maximumf %180, %181 : vector<1x1xf32>
    %cst_71 = arith.constant 9.99999993E-9 : f32
    %183 = vector.broadcast %cst_71 : f32 to vector<1x1xf32>
    %184 = arith.addf %182, %183 : vector<1x1xf32>
    %185 = math.rsqrt %184 : vector<1x1xf32>
    %186 = vector.broadcast %176 : vector<1x1xf32> to vector<16x32xf32>
    %187 = arith.subf %163, %186 : vector<16x32xf32>
    %188 = vector.broadcast %185 : vector<1x1xf32> to vector<16x32xf32>
    %189 = arith.mulf %187, %188 : vector<16x32xf32>
    %190 = vector.broadcast %69 : vector<16x1xf32> to vector<16x32xf32>
    %191 = arith.mulf %189, %190 : vector<16x32xf32>
    %192 = vector.broadcast %70 : vector<16x1xf32> to vector<16x32xf32>
    %193 = arith.addf %191, %192 : vector<16x32xf32>
    %194 = vector.extract_strided_slice %3 {offsets = [2, 0, 0], sizes = [1, 16, 32], strides = [1, 1, 1]} : vector<3x16x32xf32> to vector<1x16x32xf32>
    %195 = vector.shape_cast %194 : vector<1x16x32xf32> to vector<16x32xf32>
    %196 = arith.addf %193, %195 : vector<16x32xf32>
    %c0_72 = arith.constant 0 : index
    %c2 = arith.constant 2 : index
    %c0_73 = arith.constant 0 : index
    %c0_74 = arith.constant 0 : index
    %197 = vector.load %arg12[%c0_72, %c2, %c0_73, %c0_74] : memref<1x3x16x32xf32, #tpu.memory_space<vmem>>, vector<1x1x16x32xf32>
    %198 = vector.shape_cast %197 : vector<1x1x16x32xf32> to vector<16x32xf32>
    %199 = vector.shape_cast %196 : vector<16x32xf32> to vector<1x1x16x32xf32>
    tpu.vector_store %arg12[%c0_72, %c2, %c0_73, %c0_74], %199 {strides = array<i32>} : memref<1x3x16x32xf32, #tpu.memory_space<vmem>>, vector<1x1x16x32xf32>,
    return
  }
  func.func @transform_0(%arg0: i32, %arg1: memref<2xi32, #tpu.memory_space<smem>>) -> (i32, i32, i32, i32) {
    %c0_i32 = arith.constant 0 : i32
    %c0_i32_0 = arith.constant 0 : i32
    %c0_i32_1 = arith.constant 0 : i32
    %c0_i32_2 = arith.constant 0 : i32
    return %arg0, %c0_i32, %c0_i32_0, %c0_i32_1 : i32, i32, i32, i32
  }
  func.func @transform_1(%arg0: i32, %arg1: memref<2xi32, #tpu.memory_space<smem>>) -> (i32, i32) {
    %c0_i32 = arith.constant 0 : i32
    %c0_i32_0 = arith.constant 0 : i32
    %c0_i32_1 = arith.constant 0 : i32
    return %c0_i32, %c0_i32_0 : i32, i32
  }
  func.func @transform_2(%arg0: i32, %arg1: memref<2xi32, #tpu.memory_space<smem>>) -> (i32, i32) {
    %c0_i32 = arith.constant 0 : i32
    %c0_i32_0 = arith.constant 0 : i32
    %c0_i32_1 = arith.constant 0 : i32
    return %c0_i32, %c0_i32_0 : i32, i32
  }
  func.func @transform_3(%arg0: i32, %arg1: memref<2xi32, #tpu.memory_space<smem>>) -> (i32, i32) {
    %c0_i32 = arith.constant 0 : i32
    %c0_i32_0 = arith.constant 0 : i32
    %c0_i32_1 = arith.constant 0 : i32
    return %c0_i32, %c0_i32_0 : i32, i32
  }
  func.func @transform_4(%arg0: i32, %arg1: memref<2xi32, #tpu.memory_space<smem>>) -> (i32, i32) {
    %c0_i32 = arith.constant 0 : i32
    %c0_i32_0 = arith.constant 0 : i32
    %c0_i32_1 = arith.constant 0 : i32
    return %c0_i32, %c0_i32_0 : i32, i32
  }
  func.func @transform_5(%arg0: i32, %arg1: memref<2xi32, #tpu.memory_space<smem>>) -> (i32, i32) {
    %c0_i32 = arith.constant 0 : i32
    %c0_i32_0 = arith.constant 0 : i32
    %c0_i32_1 = arith.constant 0 : i32
    return %c0_i32, %c0_i32_0 : i32, i32
  }
  func.func @transform_6(%arg0: i32, %arg1: memref<2xi32, #tpu.memory_space<smem>>) -> (i32, i32) {
    %c0_i32 = arith.constant 0 : i32
    %c0_i32_0 = arith.constant 0 : i32
    %c0_i32_1 = arith.constant 0 : i32
    return %c0_i32, %c0_i32_0 : i32, i32
  }
  func.func @transform_7(%arg0: i32, %arg1: memref<2xi32, #tpu.memory_space<smem>>) -> (i32, i32) {
    %c0_i32 = arith.constant 0 : i32
    %c0_i32_0 = arith.constant 0 : i32
    %c0_i32_1 = arith.constant 0 : i32
    return %c0_i32, %c0_i32_0 : i32, i32
  }
  func.func @transform_8(%arg0: i32, %arg1: memref<2xi32, #tpu.memory_space<smem>>) -> (i32, i32) {
    %c0_i32 = arith.constant 0 : i32
    %c0_i32_0 = arith.constant 0 : i32
    %c0_i32_1 = arith.constant 0 : i32
    return %c0_i32, %c0_i32_0 : i32, i32
  }
  func.func @transform_9(%arg0: i32, %arg1: memref<2xi32, #tpu.memory_space<smem>>) -> (i32, i32) {
    %c0_i32 = arith.constant 0 : i32
    %c0_i32_0 = arith.constant 0 : i32
    %c0_i32_1 = arith.constant 0 : i32
    return %c0_i32, %c0_i32_0 : i32, i32
  }
  func.func @transform_10(%arg0: i32, %arg1: memref<2xi32, #tpu.memory_space<smem>>) -> (i32, i32, i32, i32) {
    %c0_i32 = arith.constant 0 : i32
    %c0_i32_0 = arith.constant 0 : i32
    %c0_i32_1 = arith.constant 0 : i32
    %c0_i32_2 = arith.constant 0 : i32
    return %arg0, %c0_i32, %c0_i32_0, %c0_i32_1 : i32, i32, i32, i32
  }
}

</mosaic_0001>

<bundles_post_ra>
// kernel: tpu_custom_call.1
= control target key start
LH: loop header
LB: loop body
LE: loop exit
PB: predicated region body
PF: predicated region fallthrough
CT: control target
= control target key end

     0   :  { %s1340_s20 = smov [#allocation3]   ;;  %s1772_s0 = inlined_call_operand.vmem [shape: s32[2], index: 0, kind: input, shape index: {}]   ;;  %s1773_s1 = inlined_call_operand.hbm [shape: f32[2,3,16,32], index: 1, kind: input, shape index: {}]   ;;  %s1774_s2 = inlined_call_operand.vmem [shape: f32[32,16], index: 2, kind: input, shape index: {}]   ;;  %s1775_s3 = inlined_call_operand.vmem [shape: f32[32,1], index: 3, kind: input, shape index: {}]   ;;  %s1776_s4 = inlined_call_operand.vmem [shape: f32[32,32], index: 4, kind: input, shape index: {}]   ;;  %s1777_s5 = inlined_call_operand.vmem [shape: f32[32,1], index: 5, kind: input, shape index: {}]   ;;  %s1778_s6 = inlined_call_operand.vmem [shape: f32[16,32], index: 6, kind: input, shape index: {}]   ;;  %s1779_s7 = inlined_call_operand.vmem [shape: f32[16,32], index: 7, kind: input, shape index: {}]   ;;  %s1780_s8 = inlined_call_operand.vmem [shape: f32[16,1], index: 8, kind: input, shape index: {}]   ;;  %s1781_s9 = inlined_call_operand.vmem [shape: f32[16,1], index: 9, kind: input, shape index: {}]   ;;  %s1782_s10 = inlined_call_operand.vmem [shape: f32[16,1], index: 10, kind: input, shape index: {}]   ;;  %s1783_s11 = inlined_call_operand.hbm [shape: f32[2,3,16,32], index: 11, kind: output, shape index: {}]  }
   0x1   :  { %s17_s19 = sshll.u32 %s1772_s0, 4  ;;  %s18_s19 = int_to_ptr.vmem [resolvable:$true] %s17_s19 }
   0x2   :  { %20 = dma.vmem_to_smem %s18_s19, 16, %s1340_s20, [#allocation2] }
   0x3   :  { %1314 = dma.done.wait [#allocation2], 16 }
   0x4   :  { %1315 = vsyncadd [#allocation2], 4294967280 }
   0x5   :  { %23 = sfence }
   0x6   :  { %24 = vsyncpa [#allocation5], 0 }
   0x7   :  { %26 = vsyncpa [#allocation5 + $0x1], 0 }
   0x8   :  { %27 = vsyncpa [#allocation6], 0 }
   0x9   :  { %29 = vsyncpa [#allocation6 + $0x1], 0  ;;  %s1409_s21 = smov 0   ;;  %s1411_s22 = smov 0  }
   0xa   :  { %s1413_s23 = smov 0   ;;  %s1415_s24 = smov 0  }
   0xb LB: > { %1789 = sst [smem:[#allocation11_spill]] %s1326_s21  ;;  %s1430_s0 = sadd.s32 4294967295, %s1338_s24   ;;  %s1338_s24 = sphi %s1415_s24, %s1800_s24   ;;  %s1334_s23 = sphi %s1413_s23, %s1802_s23   ;;  %s1330_s22 = sphi %s1411_s22, %s1804_s22   ;;  %s1326_s21 = sphi %s1409_s21, %s1803_s21  }
   0xc   : > { %1790 = sst [smem:[#allocation12_spill]] %s1334_s23  ;;  %s1111_s25 = sadd.s32 4294967294, %s1338_s24  }
   0xd   : > { %s1434_s26 = sadd.s32 1, %s1338_s24   ;;  %s42_s27 = sadd.s32 1, %s1334_s23 }
   0xe   : > { %1791 = sst [smem:[#allocation13_spill]] %s1434_s26  ;;  %s39_s28 = ssub.s32 %s1338_s24, %s1434_s26 }
   0xf   : > { %p49_p0 = scmp.ne.s32.totalorder %s1334_s23, %s1330_s22  ;;  %p40_p1 = scmp.eq.s32.totalorder %s39_s28, 0 }
  0x10   : > { %p50_p2 = scmp.eq.s32.totalorder %s1338_s24, 0  ;;  %p55_p3 = scmp.ne.s32.totalorder %s1330_s22, %s1326_s21 }
  0x11   : > { %p56_p4 = scmp.eq.s32.totalorder %s1430_s0, 0  ;;  %p268_p7 = scmp.eq.s32.totalorder %s1430_s0, 1 }
  0x12   : > { %s1446_s29 = scalar_select %p40_p1, %s1334_s23, %s42_s27  }
  0x13   : > { %p51_p5 = por %p50_p2, %p49_p0  ;;  %p1448_p6 = por %p56_p4, %p55_p3 }
  0x14   : > { %1792 = sst [smem:[#allocation14_spill]] %s1446_s29  ;;  %p274_p8 = scmp.eq.s32.totalorder %s1111_s25, 1 }
  0x15   : > { %p1113_p9 = scmp.ge.s32.totalorder %s1338_s24, 2  ;;  %p1177_p10 = scmp.lt.s32.totalorder %s1338_s24, 2 }
  0x16   : > { %p1455_p11 = por %p268_p7, %p49_p0  ;;  %p1459_p12 = por %p274_p8, %p55_p3 }
  0x17   : > { %s321_s14 = sand.u32 1, %s1334_s23   ;;  %s1148_s15 = smul.u32 48, %s1338_s24 }
  0x18   : > { %s1795_s13 = scalar_select %p1459_p12, 1, 0 }
  0x19   : > { %s1147_s16 = smul.u32 48, %s321_s14  ;;  %s330_s19 = scalar_lea.hbm %s1773_s1, %s1148_s15 }
  0x1a   : > { %1796 = sst [smem:[#allocation15_spill]] %s1795_s13  ;;  %p1468_p13 = pnand %p1177_p10, %p51_p5 }
  0x1b   : > { %s331_s25 = sshll.u32 %s330_s19, 4  ;;  %s325_s27 = scalar_lea.vmem [#allocation4], %s1147_s16  ;;  %s332_s25 = int_to_ptr.hbm [resolvable:$true] %s331_s25 }
  0x1c   : > { %s333_s28 = sshll.u32 %s325_s27, 4  ;;  %s322_s29 = scalar_lea.sflag [#allocation5], %s321_s14  ;;  %s334_s28 = int_to_ptr.vmem [resolvable:$true] %s333_s28 }
  0x1d   : > { %s1240_s26 = sshra.s32 %s332_s25, 4  ;;  %p1244_p1 = pneg %p1468_p13  ;;  %s1241_s26 = int_to_ptr.hbm [resolvable:$true] %s1240_s26 }
  0x1e   : > { %s1242_s23 = scalar_lea.hbm %s1241_s26, 48  ;;  %s1247_s18 = scalar_lea.hbm %s1773_s1, 96 }
  0x1f   : > { %p1243_p0 = scmp.ne.s32.totalorder %s1241_s26, %s1242_s23  ;;  %p1248_p4 = scmp.lt.s32.totalorder %s1241_s26, %s1773_s1 }
  0x20   : > { %p1249_p5 = scmp.lt.s32.totalorder %s1247_s18, %s1242_s23 }
  0x21   : > { %p1245_p2 = pnand %p1244_p1, %p1243_p0 }
  0x22   : > { %p1250_p7 = por %p1249_p5, %p1248_p4 }
  0x23   : > { %p1246_p3 = pneg %p1245_p2 }
  0x25   : > { %p1251_p8 = pnand %p1250_p7, %p1246_p3 }
  0x27   : > { %1254 = shalt.err (!%p1251_p8)
}
  0x28   : > { %s1341_s14 = smov 128   ;;  %s1342_s16 = smov 8  }
  0x29   : > { %1172 = dma.hbm_to_vmem [thread:$0]  (!%p1468_p13), %s332_s25, 768, %s334_s28, %s322_s29, %s1341_s14, %s1341_s14, %s1342_s16  }
  0x2a   : > { %p1115_p10 = scmp.ge.s32.totalorder %s1338_s24, 1  ;;  %p341_p0 = scmp.lt.s32.totalorder %s1338_s24, 3 }
  0x2c   : > { %p342_p1 = pnand %p1115_p10, %p341_p0 }
  0x2d   : > { %s1485_s19 = sand.u32 (!%p342_p1), 1, %s1330_s22  }
  0x2e   : > { %345 = sbr.rel (%p342_p1) target bundleno = 779 (0x30b), region = 60  ;;  %s348_s23 = scalar_lea.sflag (!%p342_p1), [#allocation5], %s1485_s19 }
  0x2f   : > { %s1149_s21 = smul.u32 (!%p342_p1), 48, %s1485_s19 }
  0x31   : > { %s351_s26 = scalar_lea.vmem (!%p342_p1), [#allocation4], %s1149_s21 }
  0x33   : > { %1317 = dma.done.wait (%p1448_p6), %s348_s23, 768  }
  0x34   : > { %1319 = vsyncadd (%p1448_p6), %s348_s23, 4294966528  ;;  %v1343_v0 = vmov 0   ;;  %s1496_s29 = sld [smem:[#allocation3 + %s1430_s0]]  ;;  %v1498_v1 = vld [vmem:[%s351_s26 + $0x8] sm:$0xff]  ;;  %v1500_v2 = vld [vmem:[%s351_s26 + $0x18] sm:$0xff]  ;;  %vm455_vm0 = vcmask 130048  }
  0x35   : > { %1218 = vset.pattern.permute.xlu1 %v1343_v0  ;;  %1217 = vset.pattern.permute.xlu0 %v1343_v0  ;;  %v1502_v3 = vld [vmem:[%s351_s26 + $0x28] sm:$0xff]  ;;  %v1507_v4 = vld [vmem:[%s351_s26] sm:$0xff]  ;;  %v1509_v5 = vld [vmem:[%s351_s26 + $0x10] sm:$0xff]  ;;  %s1714_s18 = scalar_lea.vmem [#allocation7], %s1149_s21  ;;  %s1164_s21 = smul.u32 48, %s1430_s0 }
  0x36   : > { %1219 = vset.pattern.permute.xlu2 %v1343_v0  ;;  %482 = vmatpush.msra.mxu0 %v1498_v1  ;;  %v1511_v6 = vld [vmem:[%s351_s26 + $0x20] sm:$0xff]  ;;  %v401_v8 = vld [vmem:[%s1775_s3 + $0x8] sm:$0xff]  ;;  %v403_v9 = vld [vmem:[%s1775_s3 + $0x18] sm:$0xff] }
  0x37   : > { %530 = vmatpush.msra.mxu1 %v1500_v2  ;;  %582 = vmatpush.msra.mxu2 %v1502_v3  ;;  %v396_v7 = vld [vmem:[%s1774_s2] sm:$0xff]  ;;  %v397_v11 = vld [vmem:[%s1774_s2 + $0x8] sm:$0xff]  ;;  %v402_v13 = vld [vmem:[%s1775_s3 + $0x10] sm:$0xff]  ;;  %s1034_s16 = scalar_lea.hbm %s1783_s11, %s1164_s21 }
  0x38   : > { %483 = vmatpush.msra.mxu0 %v1507_v4  ;;  %442 = vperm.xlu1 %1218, %v401_v8   ;;  %v400_v12 = vld [vmem:[%s1775_s3] sm:$0xff]  ;;  %v398_v19 = vld [vmem:[%s1774_s2 + $0x10] sm:$0xff]  ;;  %v409_v21 = vld [vmem:[%s1777_s5 + $0x8] sm:$0xff] }
  0x39   : > { %531 = vmatpush.msra.mxu1 %v1509_v5  ;;  %583 = vmatpush.msra.mxu2 %v1511_v6  ;;  %v408_v22 = vld [vmem:[%s1777_s5] sm:$0xff]  ;;  %v399_v27 = vld [vmem:[%s1774_s2 + $0x18] sm:$0xff]  ;;  %v415_v28 = vld [vmem:[%s1780_s8 + $0x8] sm:$0xff] }
  0x3a   : > { %p416_p13 = scmp.gt.s32.totalorder %s1496_s29, 1  ;;  %1116 = vmatmul.msk.f32.vlgmr.msra.gmra.mxu0 %vm455_vm0, %v396_v7  ;;  %1120 = vmatmul.msk.f32.vlgmr.msra.gmra.mxu1 %vm455_vm0, %v396_v7  ;;  %p509_p6 = scmp.gt.s32.totalorder %s1496_s29, 0 }
  0x3b   : > { %1124 = vmatmul.msk.f32.vlgmr.msra.gmra.mxu2 %vm455_vm0, %v396_v7  ;;  %452 = vperm.xlu0 %1217, %v403_v9   ;;  %p609_p2 = scmp.gt.s32.totalorder %s1496_s29, 2 }
  0x3c   : > { %s417_s20 = scalar_select %p416_p13, %s1496_s29, 1 }
  0x3e   : > { %s418_s17 = scvt.s32.f32 %s417_s20 }
  0x40   : > { %v419_v10 = vstv %s418_s17  ;;  %437 = vperm.xlu1 %1218, %v400_v12  }
  0x41   : > { %1220 = vrcp.f32 %v419_v10  ;;  %v431_v16 = vand.u32 2147483648, %v419_v10  ;;  %vm425_vm1 = vweird.f32 %v419_v10  ;;  %v429_v18 = vand.u32 2147483647, %v419_v10 }
  0x42   : > { %1117 = vmatmul.msk.f32.gmra.mxu0 %vm455_vm0, %v397_v11  ;;  %1121 = vmatmul.msk.f32.gmra.mxu1 %vm455_vm0, %v397_v11 }
  0x43   : > { %1125 = vmatmul.msk.f32.gmra.mxu2 %vm455_vm0, %v397_v11  ;;  %447 = vperm.xlu0 %1217, %v402_v13   ;;  %v432_v23 = vor.u32 1.1754944e-38, %v431_v16  ;;  %vm430_vm4 = vcmp.eq.f32.partialorder %v429_v18, 8.507059e+37 }
  0x47   : > { %v1221_v14 = vpop.eup %1220 }
  0x48   : > { %v421_v15 = vmul.f32 %v1221_v14, %v419_v10  ;;  %vm426_vm2 = vweird.f32 %v1221_v14  ;;  %622 = vperm.xlu1 %1218, %v408_v22  }
  0x49   : > { %vm427_vm3 = vmor %vm425_vm1, %vm426_vm2  ;;  %vm640_vm1 = vcmask 261120  }
  0x4a   : > { %v422_v17 = vsub.f32 1.0, %v421_v15  ;;  %1118 = vmatmul.msk.f32.gmra.mxu0 %vm455_vm0, %v398_v19  ;;  %1122 = vmatmul.msk.f32.gmra.mxu1 %vm455_vm0, %v398_v19 }
  0x4b   : > { %1126 = vmatmul.msk.f32.gmra.mxu2 %vm455_vm0, %v398_v19  ;;  %627 = vperm.xlu0 %1217, %v409_v21  }
  0x4c   : > { %v423_v20 = vmul.f32 %v1221_v14, %v422_v17 }
  0x4e   : > { %v424_v24 = vadd.f32 %v1221_v14, %v423_v20 }
  0x50   : > { %v428_v25 = vsel %vm427_vm3, %v1221_v14, %v424_v24 }
  0x51   : > { %v433_v26 = vsel %vm430_vm4, %v432_v23, %v428_v25 }
  0x52   : > { %1150 = vpush %v433_v26  ;;  %1119 = vmatmul.msk.f32.gmra.mxu0 %vm455_vm0, %v399_v27  ;;  %1123 = vmatmul.msk.f32.gmra.mxu1 %vm455_vm0, %v399_v27 }
  0x53   : > { %1127 = vmatmul.msk.f32.gmra.mxu2 %vm455_vm0, %v399_v27  ;;  %701 = vperm.xlu0 %1217, %v415_v28  }
  0x83   : > { %s1151_s23 = spop %1150 }
  0x84   : > { %s510_s26 = scalar_select %p509_p6, %s1151_s23, 0.0 }
  0x85   : > { %s558_s30 = scalar_select %p416_p13, %s1151_s23, 0.0 }
  0x86   : > { %s1806_s23 = smov (!%p609_p2, %s1151_s23), 0.0  ;;  %v1569_v42 = vstv %s510_s26  ;;  %s1037_s26 = sshll.u32 %s1034_s16, 4  ;;  %s1038_s26 = int_to_ptr.hbm [resolvable:$true] %s1037_s26 }
  0x87   : > { %v1571_v46 = vstv %s558_s30  ;;  %v1573_v47 = vstv %s1806_s23  ;;  %s1035_s23 = sshll.u32 %s1714_s18, 4  ;;  %s1023_s30 = scalar_lea.sflag [#allocation6], %s1485_s19  ;;  %s1036_s23 = int_to_ptr.vmem [resolvable:$true] %s1035_s23 }
  0x88   : > { %s1284_s29 = sshra.s32 %s1038_s26, 4  ;;  %s1285_s29 = int_to_ptr.hbm [resolvable:$true] %s1284_s29 }
  0x89   : > { %s1286_s13 = scalar_lea.hbm %s1285_s29, 48  ;;  %p1291_p7 = scmp.lt.s32.totalorder %s1285_s29, %s1783_s11 }
  0x8a   : > { %p1287_p3 = scmp.ne.s32.totalorder %s1285_s29, %s1286_s13 }
  0x8c   : > { %p1288_p4 = pnand %p1287_p3, %p1455_p11 }
  0x8e   : > { %p1289_p5 = pneg %p1288_p4 }
  0xaa   : > { %v443_v32 = vpop.permute.xlu1 %442 }
  0xad   : > { %v453_v35 = vpop.permute.xlu0 %452 }
  0xb2   : > { %v438_v39 = vpop.permute.xlu1 %437 }
  0xb5   : > { %v448_v41 = vpop.permute.xlu0 %447 }
  0xb7   : > { %v485_v29 = vpop.f32.mrf.mxu0  ;;  %v533_v30 = vpop.f32.mrf.mxu1 }
  0xb8   : > { %v486_v40 = vadd.f32 %v485_v29, %v438_v39  ;;  %v534_v45 = vadd.f32 %v533_v30, %v438_v39 }
  0xba   : > { %vm497_vm5 = vcmp.ge.f32.partialorder %v486_v40, 0.0  ;;  %v501_v53 = vmul.f32 0.25, %v486_v40  ;;  %vm545_vm10 = vcmp.ge.f32.partialorder %v534_v45, 0.0  ;;  %v549_v12 = vmul.f32 0.25, %v534_v45 }
  0xbc   : > { %v505_v25 = vsel %vm497_vm5, %v486_v40, %v501_v53  ;;  %v553_v27 = vsel %vm545_vm10, %v534_v45, %v549_v12  ;;  %v411_v40 = vld [vmem:[%s1777_s5 + $0x18] sm:$0xff] }
  0xbd   : > { %637 = vperm.xlu2 %1219, %v411_v40  }
  0xbe   : > { %v585_v31 = vpop.f32.mrf.mxu2 }
  0xbf   : > { %v488_v33 = vpop.f32.mrf.mxu0  ;;  %v536_v34 = vpop.f32.mrf.mxu1  ;;  %v586_v54 = vadd.f32 %v585_v31, %v438_v39 }
  0xc0   : > { %v489_v50 = vadd.f32 %v488_v33, %v443_v32  ;;  %v537_v55 = vadd.f32 %v536_v34, %v443_v32  ;;  %v512_v34 = vmul.f32 %v1569_v42, %v505_v25 }
  0xc1   : > { %v601_v13 = vmul.f32 0.25, %v586_v54  ;;  %vm597_vm0 = vcmp.ge.f32.partialorder %v586_v54, 0.0 }
  0xc2   : > { %v502_v0 = vmul.f32 0.25, %v489_v50  ;;  %vm498_vm11 = vcmp.ge.f32.partialorder %v489_v50, 0.0  ;;  %v550_v9 = vmul.f32 0.25, %v537_v55  ;;  %vm546_vm13 = vcmp.ge.f32.partialorder %v537_v55, 0.0 }
  0xc4   : > { %v506_v19 = vsel %vm498_vm11, %v489_v50, %v502_v0  ;;  %v554_v21 = vsel %vm546_vm13, %v537_v55, %v550_v9  ;;  %v414_v50 = vld [vmem:[%s1780_s8] sm:$0xff]  ;;  %v734_v55 = vld [vmem:[%s1778_s6 + $0x8] sm:$0xff] }
  0xc5   : > { %v513_v26 = vmul.f32 %v1569_v42, %v506_v19  ;;  %v561_v30 = vmul.f32 %v1571_v46, %v554_v21 }
  0xc6   : > { %v588_v36 = vpop.f32.mrf.mxu2 }
  0xc7   : > { %v491_v37 = vpop.f32.mrf.mxu0  ;;  %v539_v38 = vpop.f32.mrf.mxu1  ;;  %v589_v58 = vadd.f32 %v588_v36, %v443_v32  ;;  %v560_v36 = vmul.f32 %v1571_v46, %v553_v27 }
  0xc8   : > { %v492_v43 = vadd.f32 %v491_v37, %v448_v41  ;;  %v540_v48 = vadd.f32 %v539_v38, %v448_v41 }
  0xc9   : > { %v602_v14 = vmul.f32 0.25, %v589_v58  ;;  %vm598_vm14 = vcmp.ge.f32.partialorder %v589_v58, 0.0  ;;  %v564_v45 = vadd.f32 %v560_v36, %v512_v34 }
  0xca   : > { %v503_v60 = vmul.f32 0.25, %v492_v43  ;;  %vm499_vm8 = vcmp.ge.f32.partialorder %v492_v43, 0.0  ;;  %v551_v62 = vmul.f32 0.25, %v540_v48  ;;  %vm547_vm9 = vcmp.ge.f32.partialorder %v540_v48, 0.0 }
  0xcb   : > { %v606_v29 = vsel %vm598_vm14, %v589_v58, %v602_v14 }
  0xcc   : > { %v507_v11 = vsel %vm499_vm8, %v492_v43, %v503_v60  ;;  %v555_v16 = vsel %vm547_vm9, %v540_v48, %v551_v62  ;;  %v613_v39 = vmul.f32 %v1573_v47, %v606_v29  ;;  %v565_v43 = vadd.f32 %v561_v30, %v513_v26 }
  0xcd   : > { %v514_v23 = vmul.f32 %v1569_v42, %v507_v11  ;;  %v562_v24 = vmul.f32 %v1571_v46, %v555_v16 }
  0xce   : > { %v591_v44 = vpop.f32.mrf.mxu2 }
  0xcf   : > { %v494_v49 = vpop.f32.mrf.mxu0  ;;  %v542_v52 = vpop.f32.mrf.mxu1  ;;  %v592_v56 = vadd.f32 %v591_v44, %v448_v41  ;;  %v566_v38 = vadd.f32 %v562_v24, %v514_v23 }
  0xd0   : > { %v495_v51 = vadd.f32 %v494_v49, %v453_v35  ;;  %v543_v57 = vadd.f32 %v542_v52, %v453_v35  ;;  %v410_v49 = vld [vmem:[%s1777_s5 + $0x10] sm:$0xff]  ;;  %v407_v52 = vld [vmem:[%s1776_s4 + $0x18] sm:$0xff] }
  0xd1   : > { %v603_v7 = vmul.f32 0.25, %v592_v56  ;;  %vm599_vm12 = vcmp.ge.f32.partialorder %v592_v56, 0.0  ;;  %632 = vperm.xlu2 %1219, %v410_v49  }
  0xd2   : > { %vm500_vm6 = vcmp.ge.f32.partialorder %v495_v51, 0.0  ;;  %v504_v59 = vmul.f32 0.25, %v495_v51  ;;  %vm548_vm7 = vcmp.ge.f32.partialorder %v543_v57, 0.0  ;;  %v552_v61 = vmul.f32 0.25, %v543_v57 }
  0xd3   : > { %v607_v22 = vsel %vm599_vm12, %v592_v56, %v603_v7  ;;  %v623_v7 = vpop.permute.xlu1 %622 }
  0xd4   : > { %v508_v63 = vsel %vm500_vm6, %v495_v51, %v504_v59  ;;  %v556_v8 = vsel %vm548_vm7, %v543_v57, %v552_v61  ;;  %v614_v33 = vmul.f32 %v1573_v47, %v607_v22  ;;  %v406_v51 = vld [vmem:[%s1776_s4 + $0x10] sm:$0xff]  ;;  %v628_v61 = vpop.permute.xlu0 %627 }
  0xd5   : > { %757 = vmatpush.msrb.mxu1 %v508_v63  ;;  %862 = vmatpush.msrb.mxu2 %v556_v8  ;;  %v515_v17 = vmul.f32 %v1569_v42, %v508_v63  ;;  %v563_v18 = vmul.f32 %v1571_v46, %v556_v8  ;;  %v617_v42 = vadd.f32 %v613_v39, %v565_v43  ;;  %v404_v46 = vld [vmem:[%s1776_s4] sm:$0xff] }
  0xd6   : > { %v594_v10 = vpop.f32.mrf.mxu2  ;;  %v618_v41 = vadd.f32 %v614_v33, %v566_v38 }
  0xd7   : > { %v595_v15 = vadd.f32 %v594_v10, %v453_v35  ;;  %758 = vmatpush.msrb.mxu1 %v507_v11  ;;  %863 = vmatpush.msrb.mxu2 %v555_v16  ;;  %v567_v31 = vadd.f32 %v563_v18, %v515_v17  ;;  %v605_v35 = vsel %vm597_vm0, %v586_v54, %v601_v13  ;;  %v733_v54 = vld [vmem:[%s1778_s6] sm:$0xff]  ;;  %v413_v18 = vld [vmem:[%s1779_s7 + $0x8] sm:$0xff] }
  0xd8   : > { %v612_v44 = vmul.f32 %v1573_v47, %v605_v35  ;;  %v412_v16 = vld [vmem:[%s1779_s7] sm:$0xff] }
  0xd9   : > { %vm600_vm15 = vcmp.ge.f32.partialorder %v595_v15, 0.0  ;;  %v604_v20 = vmul.f32 0.25, %v595_v15  ;;  %759 = vmatpush.msrb.mxu1 %v506_v19  ;;  %864 = vmatpush.msrb.mxu2 %v554_v21 }
  0xda   : > { %v616_v48 = vadd.f32 %v612_v44, %v564_v45  ;;  %696 = vperm.xlu2 %1219, %v414_v50  }
  0xdb   : > { %760 = vmatpush.msrb.mxu1 %v505_v25  ;;  %v608_v28 = vsel %vm600_vm15, %v595_v15, %v604_v20  ;;  %865 = vmatpush.msrb.mxu2 %v553_v27 }
  0xdc   : > { %v615_v32 = vmul.f32 %v1573_v47, %v608_v28  ;;  %v405_v47 = vld [vmem:[%s1776_s4 + $0x8] sm:$0xff]  ;;  %1136 = vmatmul.msk.f32.vlgmr.msrb.gmra.mxu2 %vm640_vm1, %v733_v54  ;;  %1134 = vmatmul.msk.f32.vlgmr.msrb.gmra.mxu1 %vm640_vm1, %v733_v54  ;;  %v702_v27 = vpop.permute.xlu0 %701 }
  0xde   : > { %v619_v37 = vadd.f32 %v615_v32, %v567_v31 }
  0xe0   : > { %665 = vmatpush.msra.mxu3 %v619_v37 }
  0xe2   : > { %666 = vmatpush.msra.mxu3 %v618_v41 }
  0xe4   : > { %667 = vmatpush.msra.mxu3 %v617_v42  ;;  %1137 = vmatmul.msk.f32.gmra.mxu2 %vm640_vm1, %v734_v55 }
  0xe5   : > { %1135 = vmatmul.msk.f32.gmra.mxu1 %vm640_vm1, %v734_v55 }
  0xe6   : > { %668 = vmatpush.msra.mxu3 %v616_v48 }
  0xe7   : > { %1128 = vmatmul.msk.f32.vlgmr.msra.gmra.mxu3 %vm640_vm1, %v404_v46 }
  0xe8   : > { %948 = vmatpush.msrb.mxu3 %v608_v28 }
  0xea   : > { %949 = vmatpush.msrb.mxu3 %v607_v22 }
  0xec   : > { %950 = vmatpush.msrb.mxu3 %v606_v29 }
  0xee   : > { %951 = vmatpush.msrb.mxu3 %v605_v35 }
  0xef   : > { %1129 = vmatmul.msk.f32.gmra.mxu3 %vm640_vm1, %v405_v47 }
  0xf7   : > { %1130 = vmatmul.msk.f32.gmra.mxu3 %vm640_vm1, %v406_v51 }
  0xff   : > { %1131 = vmatmul.msk.f32.gmra.mxu3 %vm640_vm1, %v407_v52 }
 0x107   : > { %1140 = vmatmul.msk.f32.vlgmr.msrb.gmra.mxu3 %vm640_vm1, %v733_v54 }
 0x10f   : > { %1141 = vmatmul.msk.f32.gmra.mxu3 %vm640_vm1, %v734_v55 }
 0x117   : > { %v638_v57 = vpop.permute.xlu2 %637 }
 0x12b   : > { %v633_v59 = vpop.permute.xlu2 %632 }
 0x134   : > { %v697_v22 = vpop.permute.xlu2 %696 }
 0x159   : > { %v762_v19 = vpop.f32.mrf.mxu1 }
 0x15f   : > { %v867_v20 = vpop.f32.mrf.mxu2 }
 0x162   : > { %v765_v30 = vpop.f32.mrf.mxu1 }
 0x167   : > { %v870_v31 = vpop.f32.mrf.mxu2 }
 0x16a   : > { %v670_v53 = vpop.f32.mrf.mxu3 }
 0x16b   : > { %v671_v8 = vadd.f32 %v670_v53, %v623_v7 }
 0x16d   : > { %v686_v14 = vmul.f32 0.25, %v671_v8  ;;  %vm682_vm5 = vcmp.ge.f32.partialorder %v671_v8, 0.0 }
 0x16f   : > { %v690_v17 = vsel %vm682_vm5, %v671_v8, %v686_v14 }
 0x172   : > { %v673_v56 = vpop.f32.mrf.mxu3 }
 0x173   : > { %v674_v63 = vadd.f32 %v673_v56, %v628_v61 }
 0x175   : > { %v687_v12 = vmul.f32 0.25, %v674_v63  ;;  %vm683_vm4 = vcmp.ge.f32.partialorder %v674_v63, 0.0 }
 0x177   : > { %v691_v15 = vsel %vm683_vm4, %v674_v63, %v687_v12 }
 0x17a   : > { %v676_v58 = vpop.f32.mrf.mxu3 }
 0x17b   : > { %v677_v60 = vadd.f32 %v676_v58, %v633_v59 }
 0x17d   : > { %v688_v10 = vmul.f32 0.25, %v677_v60  ;;  %vm684_vm3 = vcmp.ge.f32.partialorder %v677_v60, 0.0 }
 0x17f   : > { %v692_v13 = vsel %vm684_vm3, %v677_v60, %v688_v10 }
 0x182   : > { %v679_v62 = vpop.f32.mrf.mxu3 }
 0x183   : > { %v680_v0 = vadd.f32 %v679_v62, %v638_v57 }
 0x185   : > { %vm685_vm2 = vcmp.ge.f32.partialorder %v680_v0, 0.0  ;;  %v689_v9 = vmul.f32 0.25, %v680_v0 }
 0x187   : > { %v693_v11 = vsel %vm685_vm2, %v680_v0, %v689_v9 }
 0x188   : > { %722 = vmatpush.msrb.mxu0 %v693_v11 }
 0x18a   : > { %723 = vmatpush.msrb.mxu0 %v692_v13  ;;  %v953_v21 = vpop.f32.mrf.mxu3 }
 0x18c   : > { %724 = vmatpush.msrb.mxu0 %v691_v15  ;;  %v735_v15 = vld [vmem:[%s1781_s9] sm:$0xff] }
 0x18e   : > { %725 = vmatpush.msrb.mxu0 %v690_v17  ;;  %v736_v17 = vld [vmem:[%s1781_s9 + $0x8] sm:$0xff] }
 0x18f   : > { %1132 = vmatmul.msk.f32.vlgmr.msrb.gmra.mxu0 %vm640_vm1, %v412_v16  ;;  %v738_v16 = vld [vmem:[%s1782_s10 + $0x8] sm:$0xff] }
 0x192   : > { %v956_v33 = vpop.f32.mrf.mxu3 }
 0x197   : > { %1133 = vmatmul.msk.f32.gmra.mxu0 %vm640_vm1, %v413_v18  ;;  %v737_v18 = vld [vmem:[%s1782_s10] sm:$0xff] }
 0x20c   : > { %v727_v23 = vpop.f32.mrf.mxu0 }
 0x20d   : > { %v728_v24 = vadd.f32 %v727_v23, %v697_v22 }
 0x20f   : > { %v763_v25 = vadd.f32 %v762_v19, %v728_v24  ;;  %v868_v26 = vadd.f32 %v867_v20, %v728_v24  ;;  %v954_v40 = vadd.f32 %v953_v21, %v728_v24 }
 0x211   : > { %v875_v28 = vmul.f32 0.25, %v868_v26  ;;  %v770_v29 = vmul.f32 0.25, %v763_v25  ;;  %vm873_vm6 = vcmp.ge.f32.partialorder %v868_v26, 0.0  ;;  %vm768_vm7 = vcmp.ge.f32.partialorder %v763_v25, 0.0 }
 0x212   : > { %v961_v52 = vmul.f32 0.25, %v954_v40  ;;  %vm959_vm11 = vcmp.ge.f32.partialorder %v954_v40, 0.0 }
 0x213   : > { %v1639_v35 = vsel %vm873_vm6, %v868_v26, %v875_v28  ;;  %v1641_v39 = vsel %vm768_vm7, %v763_v25, %v770_v29 }
 0x214   : > { %v730_v32 = vpop.f32.mrf.mxu0  ;;  %v879_v44 = vsel %vm640_vm1, %v1639_v35, 0.0  ;;  %v787_v42 = vmul.f32 %v1641_v39, %v1641_v39  ;;  %v774_v49 = vsel %vm640_vm1, %v1641_v39, 0.0  ;;  %v1665_v60 = vsel %vm959_vm11, %v954_v40, %v961_v52 }
 0x215   : > { %v731_v34 = vadd.f32 %v730_v32, %v702_v27  ;;  %v892_v62 = vmul.f32 %v1639_v35, %v1639_v35  ;;  %v965_v63 = vsel %vm640_vm1, %v1665_v60, 0.0  ;;  %v978_v11 = vmul.f32 %v1665_v60, %v1665_v60 }
 0x216   : > { %v789_v55 = vsel %vm640_vm1, %v787_v42, 0.0 }
 0x217   : > { %v766_v36 = vadd.f32 %v765_v30, %v731_v34  ;;  %v871_v37 = vadd.f32 %v870_v31, %v731_v34  ;;  %v957_v38 = vadd.f32 %v956_v33, %v731_v34  ;;  %v894_v8 = vsel %vm640_vm1, %v892_v62, 0.0 }
 0x218   : > { %v980_v13 = vsel %vm640_vm1, %v978_v11, 0.0 }
 0x219   : > { %vm769_vm8 = vcmp.ge.f32.partialorder %v766_v36, 0.0  ;;  %v771_v41 = vmul.f32 0.25, %v766_v36  ;;  %vm874_vm9 = vcmp.ge.f32.partialorder %v871_v37, 0.0  ;;  %v876_v43 = vmul.f32 0.25, %v871_v37 }
 0x21a   : > { %v962_v45 = vmul.f32 0.25, %v957_v38  ;;  %vm960_vm10 = vcmp.ge.f32.partialorder %v957_v38, 0.0 }
 0x21b   : > { %v1647_v48 = vsel %vm874_vm9, %v871_v37, %v876_v43  ;;  %v1649_v46 = vsel %vm769_vm8, %v766_v36, %v771_v41 }
 0x21c   : > { %v880_v47 = vsel %vm640_vm1, %v1647_v48, 0.0  ;;  %v775_v50 = vsel %vm640_vm1, %v1649_v46, 0.0  ;;  %v788_v51 = vmul.f32 %v1649_v46, %v1649_v46  ;;  %v1661_v58 = vsel %vm960_vm10, %v957_v38, %v962_v45 }
 0x21d   : > { %v881_v53 = vadd.f32 %v880_v47, %v879_v44  ;;  %v776_v54 = vadd.f32 %v775_v50, %v774_v49  ;;  %v893_v59 = vmul.f32 %v1647_v48, %v1647_v48  ;;  %v966_v61 = vsel %vm640_vm1, %v1661_v58, 0.0 }
 0x21e   : > { %v790_v56 = vsel %vm640_vm1, %v788_v51, 0.0  ;;  %v967_v7 = vadd.f32 %v966_v61, %v965_v63  ;;  %v979_v10 = vmul.f32 %v1661_v58, %v1661_v58 }
 0x21f   : > { %882 = vadd.xlane.f32.xlu0 %v881_v53  ;;  %777 = vadd.xlane.f32.xlu1 %v776_v54  ;;  %v791_v57 = vadd.f32 %v790_v56, %v789_v55  ;;  %v895_v0 = vsel %vm640_vm1, %v893_v59, 0.0 }
 0x220   : > { %v896_v9 = vadd.f32 %v895_v0, %v894_v8  ;;  %v981_v12 = vsel %vm640_vm1, %v979_v10, 0.0 }
 0x221   : > { %792 = vadd.xlane.f32.xlu2 %v791_v57  ;;  %v982_v14 = vadd.f32 %v981_v12, %v980_v13 }
 0x227   : > { %968 = vadd.xlane.f32.xlu1 %v967_v7 }
 0x229   : > { %897 = vadd.xlane.f32.xlu2 %v896_v9 }
 0x231   : > { %983 = vadd.xlane.f32.xlu2 %v982_v14 }
 0x233   : > { %824 = vperm.xlu0 %1217, %v735_v15  }
 0x23b   : > { %841 = vperm.xlu0 %1217, %v738_v16  }
 0x240   : > { %829 = vperm.xlu1 %1218, %v736_v17  }
 0x249   : > { %836 = vperm.xlu2 %1219, %v737_v18  }
 0x292   : > { %v883_v19 = vpop.xlane.xlu0 %882  ;;  %v778_v20 = vpop.xlane.xlu1 %777 }
 0x293   : > { %v884_v21 = vrot.slane %v883_v19, 4  ;;  %v779_v22 = vrot.slane %v778_v20, 4 }
 0x294   : > { %v793_v23 = vpop.xlane.xlu2 %792 }
 0x295   : > { %v885_v24 = vadd.f32 %v884_v21, %v883_v19  ;;  %v780_v25 = vadd.f32 %v779_v22, %v778_v20  ;;  %v794_v26 = vrot.slane %v793_v23, 4 }
 0x297   : > { %v886_v27 = vrot.slane %v885_v24, 2  ;;  %v781_v28 = vrot.slane %v780_v25, 2  ;;  %v795_v29 = vadd.f32 %v794_v26, %v793_v23 }
 0x299   : > { %v796_v30 = vrot.slane %v795_v29, 2  ;;  %v782_v31 = vadd.f32 %v781_v28, %v780_v25  ;;  %v887_v32 = vadd.f32 %v886_v27, %v885_v24 }
 0x29a   : > { %v969_v33 = vpop.xlane.xlu1 %968 }
 0x29b   : > { %v970_v34 = vrot.slane %v969_v33, 4  ;;  %v783_v36 = vrot.slane %v782_v31, 1  ;;  %v797_v37 = vadd.f32 %v796_v30, %v795_v29  ;;  %v888_v40 = vrot.slane %v887_v32, 1 }
 0x29c   : > { %v898_v38 = vpop.xlane.xlu2 %897 }
 0x29d   : > { %v971_v41 = vadd.f32 %v970_v34, %v969_v33  ;;  %v899_v43 = vrot.slane %v898_v38, 4  ;;  %v784_v44 = vadd.f32 %v783_v36, %v782_v31  ;;  %v798_v42 = vrot.slane %v797_v37, 1 }
 0x29e   : > { %v889_v50 = vadd.f32 %v888_v40, %v887_v32 }
 0x29f   : > { %v972_v45 = vrot.slane %v971_v41, 2  ;;  %v900_v49 = vadd.f32 %v899_v43, %v898_v38  ;;  %1152 = vpush %v784_v44  ;;  %v799_v47 = vadd.f32 %v798_v42, %v797_v37 }
 0x2a1   : > { %v901_v51 = vrot.slane %v900_v49, 2  ;;  %1154 = vpush %v799_v47  ;;  %v973_v52 = vadd.f32 %v972_v45, %v971_v41 }
 0x2a2   : > { %1156 = vpush %v889_v50 }
 0x2a3   : > { %v902_v53 = vadd.f32 %v901_v51, %v900_v49  ;;  %v974_v55 = vrot.slane %v973_v52, 1 }
 0x2a4   : > { %v984_v54 = vpop.xlane.xlu2 %983 }
 0x2a5   : > { %v985_v56 = vrot.slane %v984_v54, 4  ;;  %v903_v57 = vrot.slane %v902_v53, 1  ;;  %v975_v62 = vadd.f32 %v974_v55, %v973_v52  ;;  %v1701_v34 = vpop.permute.xlu0 %824 }
 0x2a7   : > { %v986_v59 = vadd.f32 %v985_v56, %v984_v54  ;;  %v904_v61 = vadd.f32 %v903_v57, %v902_v53 }
 0x2a9   : > { %v987_v63 = vrot.slane %v986_v59, 2  ;;  %1158 = vpush %v904_v61 }
 0x2aa   : > { %1160 = vpush %v975_v62 }
 0x2ab   : > { %v988_v0 = vadd.f32 %v987_v63, %v986_v59 }
 0x2ac   : > { %v837_v56 = vpop.permute.xlu2 %836 }
 0x2ad   : > { %v989_v7 = vrot.slane %v988_v0, 1  ;;  %v842_v57 = vpop.permute.xlu0 %841 }
 0x2af   : > { %v990_v8 = vadd.f32 %v989_v7, %v988_v0 }
 0x2b1   : > { %1162 = vpush %v990_v8 }
 0x2b2   : > { %v830_v52 = vpop.permute.xlu1 %829 }
 0x2d0   : > { %s1153_s20 = spop %1152 }
 0x2d1   : > { %v786_v9 = vstv %s1153_s20 }
 0x2d2   : > { %v802_v10 = vmul.f32 0.001953125, %v786_v9  ;;  %s1155_s25 = spop %1154 }
 0x2d3   : > { %v801_v11 = vstv %s1155_s25  ;;  %s1157_s27 = spop %1156 }
 0x2d4   : > { %v803_v12 = vmul.f32 0.001953125, %v801_v11  ;;  %v804_v13 = vmul.f32 %v802_v10, %v802_v10  ;;  %v891_v14 = vstv %s1157_s27  ;;  %v818_v42 = vsub.f32 %v1641_v39, %v802_v10  ;;  %s1290_s27 = scalar_lea.hbm %s1783_s11, 96 }
 0x2d5   : > { %v1693_v17 = vmul.f32 0.001953125, %v891_v14  ;;  %v819_v45 = vsub.f32 %v1649_v46, %v802_v10  ;;  %p1292_p8 = scmp.lt.s32.totalorder %s1290_s27, %s1286_s13 }
 0x2d6   : > { %v805_v15 = vsub.f32 %v803_v12, %v804_v13 }
 0x2d7   : > { %v909_v21 = vmul.f32 %v1693_v17, %v1693_v17  ;;  %v923_v8 = vsub.f32 %v1639_v35, %v1693_v17  ;;  %v924_v9 = vsub.f32 %v1647_v48, %v1693_v17  ;;  %p1293_p10 = por %p1292_p8, %p1291_p7 }
 0x2d8   : > { %v806_v16 = vmax.f32 %v805_v15, 0.0 }
 0x2d9   : > { %p1294_p0 = pnand %p1293_p10, %p1289_p5 }
 0x2da   : > { %v807_v18 = vadd.f32 1e-08, %v806_v16  ;;  %s1159_s28 = spop %1158 }
 0x2db   : > { %v906_v19 = vstv %s1159_s28  ;;  %s1161_s15 = spop %1160 }
 0x2dc   : > { %1222 = vrsqrt.f32 %v807_v18  ;;  %v908_v20 = vmul.f32 0.001953125, %v906_v19  ;;  %v977_v22 = vstv %s1161_s15  ;;  %vm814_vm13 = vweird.f32 %v807_v18 }
 0x2dd   : > { %v1697_v25 = vmul.f32 0.001953125, %v977_v22 }
 0x2de   : > { %v910_v23 = vsub.f32 %v908_v20, %v909_v21 }
 0x2df   : > { %v995_v31 = vmul.f32 %v1697_v25, %v1697_v25  ;;  %v1009_v19 = vsub.f32 %v1665_v60, %v1697_v25  ;;  %v1010_v20 = vsub.f32 %v1661_v58, %v1697_v25 }
 0x2e0   : > { %v911_v24 = vmax.f32 %v910_v23, 0.0 }
 0x2e2   : > { %v1223_v26 = vpop.eup %1222  ;;  %v912_v27 = vadd.f32 1e-08, %v911_v24  ;;  %s1163_s17 = spop %1162 }
 0x2e3   : > { %v809_v28 = vmul.f32 %v1223_v26, %v807_v18  ;;  %v992_v29 = vstv %s1163_s17  ;;  %vm815_vm12 = vweird.f32 %v1223_v26 }
 0x2e4   : > { %1224 = vrsqrt.f32 %v912_v27  ;;  %v994_v30 = vmul.f32 0.001953125, %v992_v29  ;;  %vm816_vm14 = vmor %vm814_vm13, %vm815_vm12  ;;  %vm919_vm0 = vweird.f32 %v912_v27 }
 0x2e5   : > { %v810_v32 = vmul.f32 %v1223_v26, %v809_v28 }
 0x2e6   : > { %v996_v33 = vsub.f32 %v994_v30, %v995_v31 }
 0x2e7   : > { %v811_v36 = vmul.f32 0.5, %v810_v32 }
 0x2e8   : > { %v997_v37 = vmax.f32 %v996_v33, 0.0 }
 0x2e9   : > { %v812_v38 = vsub.f32 1.5, %v811_v36 }
 0x2ea   : > { %v1225_v40 = vpop.eup %1224  ;;  %v998_v41 = vadd.f32 1e-08, %v997_v37 }
 0x2eb   : > { %v813_v43 = vmul.f32 %v1223_v26, %v812_v38  ;;  %v914_v44 = vmul.f32 %v1225_v40, %v912_v27  ;;  %vm920_vm15 = vweird.f32 %v1225_v40 }
 0x2ec   : > { %1226 = vrsqrt.f32 %v998_v41  ;;  %vm921_vm2 = vmor %vm919_vm0, %vm920_vm15  ;;  %vm1005_vm4 = vweird.f32 %v998_v41 }
 0x2ed   : > { %v817_v49 = vsel %vm816_vm14, %v1223_v26, %v813_v43  ;;  %v915_v47 = vmul.f32 %v1225_v40, %v914_v44 }
 0x2ee   : > { %v820_v50 = vmul.f32 %v818_v42, %v817_v49  ;;  %v821_v51 = vmul.f32 %v819_v45, %v817_v49 }
 0x2ef   : > { %v916_v53 = vmul.f32 0.5, %v915_v47 }
 0x2f0   : > { %v832_v54 = vmul.f32 %v1701_v34, %v820_v50  ;;  %v833_v55 = vmul.f32 %v830_v52, %v821_v51 }
 0x2f1   : > { %v917_v59 = vsub.f32 1.5, %v916_v53 }
 0x2f2   : > { %v1227_v61 = vpop.eup %1226  ;;  %v844_v39 = vadd.f32 %v837_v56, %v832_v54  ;;  %v845_v62 = vadd.f32 %v842_v57, %v833_v55 }
 0x2f3   : > { %v918_v46 = vmul.f32 %v1225_v40, %v917_v59  ;;  %v1000_v63 = vmul.f32 %v1227_v61, %v998_v41  ;;  %vm1006_vm3 = vweird.f32 %v1227_v61 }
 0x2f4   : > { %v846_v0 = vadd.f32 %v844_v39, %v1507_v4  ;;  %v847_v7 = vadd.f32 %v845_v62, %v1498_v1  ;;  %vm1007_vm5 = vmor %vm1005_vm4, %vm1006_vm3 }
 0x2f5   : > { %v922_v10 = vsel %vm921_vm2, %v1225_v40, %v918_v46  ;;  %v1001_v11 = vmul.f32 %v1227_v61, %v1000_v63 }
 0x2f6   : > { %848 = vst.msk [vmem:[%s1714_s18] sm:$0xff] %vm640_vm1, %v846_v0  ;;  %v925_v4 = vmul.f32 %v923_v8, %v922_v10  ;;  %v926_v12 = vmul.f32 %v924_v9, %v922_v10 }
 0x2f7   : > { %849 = vst.msk [vmem:[%s1714_s18 + $0x8] sm:$0xff] %vm640_vm1, %v847_v7  ;;  %v1002_v1 = vmul.f32 0.5, %v1001_v11 }
 0x2f8   : > { %v927_v35 = vmul.f32 %v925_v4, %v1701_v34  ;;  %v928_v48 = vmul.f32 %v926_v12, %v830_v52 }
 0x2f9   : > { %v1003_v13 = vsub.f32 1.5, %v1002_v1 }
 0x2fa   : > { %v929_v14 = vadd.f32 %v927_v35, %v837_v56  ;;  %v930_v15 = vadd.f32 %v928_v48, %v842_v57 }
 0x2fb   : > { %v1004_v16 = vmul.f32 %v1227_v61, %v1003_v13 }
 0x2fc   : > { %v931_v17 = vadd.f32 %v929_v14, %v1509_v5  ;;  %v932_v18 = vadd.f32 %v930_v15, %v1500_v2 }
 0x2fd   : > { %v1008_v21 = vsel %vm1007_vm5, %v1227_v61, %v1004_v16 }
 0x2fe   : > { %1138 = vst.msk [vmem:[%s1714_s18 + $0x10] sm:$0xff] %vm640_vm1, %v931_v17  ;;  %v1011_v22 = vmul.f32 %v1009_v19, %v1008_v21  ;;  %v1012_v23 = vmul.f32 %v1010_v20, %v1008_v21 }
 0x2ff   : > { %1139 = vst.msk [vmem:[%s1714_s18 + $0x18] sm:$0xff] %vm640_vm1, %v932_v18 }
 0x300   : > { %v1013_v2 = vmul.f32 %v1011_v22, %v1701_v34  ;;  %v1014_v5 = vmul.f32 %v1012_v23, %v830_v52 }
 0x302   : > { %v1015_v58 = vadd.f32 %v1013_v2, %v837_v56  ;;  %v1016_v60 = vadd.f32 %v1014_v5, %v842_v57 }
 0x304   : > { %v1017_v24 = vadd.f32 %v1015_v58, %v1511_v6  ;;  %v1018_v25 = vadd.f32 %v1016_v60, %v1502_v3 }
 0x306   : > { %1142 = vst.msk [vmem:[%s1714_s18 + $0x20] sm:$0xff] %vm640_vm1, %v1017_v24 }
 0x307   : > { %1143 = vst.msk [vmem:[%s1714_s18 + $0x28] sm:$0xff] %vm640_vm1, %v1018_v25 }
 0x308   : > { %1297 = shalt.err (!%p1294_p0)
}
 0x309   : > { %s1344_s19 = smov 128   ;;  %s1345_s17 = smov 8  }
 0x30a   : > { %1167 = dma.vmem_to_hbm [thread:$0]  (%p1455_p11), %s1036_s23, 768, %s1038_s26, %s1023_s30, %s1344_s19, %s1344_s19, %s1345_s17  }
 0x30b PF: > { %s1798_s18 = sld [smem:[#allocation11_spill]]  ;;  %p1174_p1 = pnand %p1113_p9, %p1459_p12 }
 0x30d   : > { %p1175_p13 = pneg %p1174_p1 }
 0x311   : > { %s1052_s0 = sand.u32 1, %s1798_s18  }
 0x312   : > { %s1053_s14 = scalar_lea.sflag [#allocation6], %s1052_s0 }
 0x313   : > { %1321 = dma.done.wait (%p1175_p13), %s1053_s14, 768  }
 0x314   : > { %1323 = vsyncadd (%p1175_p13), %s1053_s14, 4294966528  ;;  %s1800_s24 = sld [smem:[#allocation13_spill]]  ;;  %s1803_s21 = smov %s1330_s22 }
 0x315   : > { %s1801_s16 = sld [smem:[#allocation12_spill]] }
 0x316   : > { %s1802_s23 = sld [smem:[#allocation14_spill]] }
 0x31a   : > { %p32_p6 = scmp.ge.s32.totalorder %s1800_s24, 4  }
 0x31b   : > { %s1804_s22 = smov %s1801_s16 }
 0x31c   :  { %34 = sbr.rel (!%p32_p6) target bundleno = 11 (0xb), region = 107 }
 0x321   :  { %1059 = vsyncpa [#allocation5], 1 }
 0x322   :  { %1061 = vsyncpa [#allocation5 + $0x1], 1 }
 0x323   :  { %1062 = vsyncpa [#allocation6], 1 }
 0x324   :  { %1064 = vsyncpa [#allocation6 + $0x1], 1 }

</bundles_post_ra>
